<compile_context>
chip_gen: v7x
topology: tpu7x:2x2x1
jax: 0.10.0
libtpu: 0.0.40
codegen_flags: <defaults>
</compile_context>

<pallas_src>
import math
import functools

import jax
import jax.numpy as jnp
from jax.experimental import pallas as pl
from jax.experimental.pallas import tpu as pltpu


# ------------------------------ helpers -------------------------------------

def _round_up(x, m):
    return (x + m - 1) // m * m


def _pick_tile(dim, candidates):
    """Return (tile, padded_dim): largest candidate dividing dim, else full
    extent when small, else pad up to a multiple of the smallest candidate."""
    for t in candidates:
        if dim >= t and dim % t == 0:
            return t, dim
    if dim < candidates[0]:
        return dim, dim
    t = candidates[-1]
    return t, _round_up(dim, t)


def _pad2d(a, rows, cols):
    pr, pc = rows - a.shape[0], cols - a.shape[1]
    if pr or pc:
        a = jnp.pad(a, ((0, pr), (0, pc)))
    return a


# --------------------------- Pallas kernels ---------------------------------

def _layernorm_kernel(x_ref, g_ref, b_ref, o_ref):
    x = x_ref[...].astype(jnp.float32)                        # (tm, C)
    mean = jnp.mean(x, axis=-1, keepdims=True)
    mean2 = jnp.mean(x * x, axis=-1, keepdims=True)           # single pass stats
    var = mean2 - mean * mean
    xhat = (x - mean) * jax.lax.rsqrt(var + 1e-5)
    o_ref[...] = (xhat * g_ref[...] + b_ref[...]).astype(o_ref.dtype)


def _linear_kernel(x_ref, w_ref, *rest, activation, transpose_rhs,
                   has_bias, has_residual):
    refs = list(rest)
    acc_ref = refs.pop()                                      # scratch (last)
    o_ref = refs.pop()                                        # output
    b_ref = refs.pop(0) if has_bias else None
    r_ref = refs.pop(0) if has_residual else None

    k = pl.program_id(2)

    @pl.when(k == 0)
    def _():
        acc_ref[...] = jnp.zeros_like(acc_ref)

    x = x_ref[...]                                            # (tm, tk) bf16
    w = w_ref[...]                                            # (tk,tn) / (tn,tk)
    if transpose_rhs:
        # NOTE: contraction on rhs dim 1; if the bundle shows per-tile vxpose
        # stealing the vex slot, pre-transpose wte once per forward instead.
        acc_ref[...] += jax.lax.dot_general(
            x, w, (((1,), (1,)), ((), ())),
            preferred_element_type=jnp.float32)
    else:
        acc_ref[...] += jnp.dot(x, w, preferred_element_type=jnp.float32)

    @pl.when(k == pl.num_programs(2) - 1)
    def _():
        y = acc_ref[...]
        if has_bias:
            y = y + b_ref[...].astype(jnp.float32)
        if activation == "gelu_tanh":
            c = math.sqrt(2.0 / math.pi)
            y = 0.5 * y * (1.0 + jnp.tanh(c * (y + 0.044715 * y * y * y)))
        if has_residual:
            y = y + r_ref[...].astype(jnp.float32)
        o_ref[...] = y.astype(o_ref.dtype)


def _flash_attn_kernel(q_ref, k_ref, v_ref, o_ref, m_ref, l_ref, acc_ref, *,
                       n_head, d_head, tq, tkv):
    qi = pl.program_id(1)
    ki = pl.program_id(2)

    @pl.when(ki == 0)
    def _():
        m_ref[...] = jnp.full_like(m_ref, -1e30)
        l_ref[...] = jnp.zeros_like(l_ref)
        acc_ref[...] = jnp.zeros_like(acc_ref)

    def attend(masked):
        if masked:
            row = qi * tq + jax.lax.broadcasted_iota(jnp.int32, (tq, tkv), 0)
            col = ki * tkv + jax.lax.broadcasted_iota(jnp.int32, (tq, tkv), 1)
            mask = col <= row
        for h in range(n_head):                               # unrolled, small H
            sl = slice(h * d_head, (h + 1) * d_head)
            qh = q_ref[0, :, sl]                              # (tq, Dh)  bf16 (pre-scaled)
            kh = k_ref[0, :, sl]                              # (tkv, Dh) bf16
            vh = v_ref[0, :, sl]
            s = jax.lax.dot_general(
                qh, kh, (((1,), (1,)), ((), ())),
                preferred_element_type=jnp.float32)           # (tq, tkv) f32
            if masked:
                s = jnp.where(mask, s, -1e30)
            m_prev = m_ref[h]                                 # (tq, 1)
            m_new = jnp.maximum(m_prev, jnp.max(s, axis=-1, keepdims=True))
            alpha = jnp.exp(m_prev - m_new)
            p = jnp.exp(s - m_new)                            # masked entries underflow to 0
            l_ref[h] = alpha * l_ref[h] + jnp.sum(p, axis=-1, keepdims=True)
            # Per-head lane-0-aligned accumulator slab (no 64-lane-offset RMW).
            acc_ref[h] = alpha * acc_ref[h] + jnp.dot(
                p.astype(vh.dtype), vh, preferred_element_type=jnp.float32)
            m_ref[h] = m_new

    @pl.when(ki < qi)            # interior block: no mask work at all
    def _():
        attend(False)

    @pl.when(ki == qi)           # diagonal block: the only one needing the mask
    def _():
        attend(True)

    @pl.when(ki == pl.num_programs(2) - 1)
    def _():
        # Per-head reciprocal scale, then one lane-dense (tq, C) store.
        scaled = []
        for h in range(n_head):
            inv = pl.reciprocal(jnp.maximum(l_ref[h], 1e-20), approx=True)
            scaled.append(acc_ref[h] * inv)
        o_ref[0] = jnp.concatenate(scaled, axis=-1).astype(o_ref.dtype)


# ------------------------------ wrappers -------------------------------------

def layernorm(x, g, b, out_dtype=jnp.bfloat16):
    M, C = x.shape
    tm, Mp = _pick_tile(M, (1024, 512, 256, 128))
    xp = _pad2d(x, Mp, C)
    out = pl.pallas_call(
        _layernorm_kernel,
        out_shape=jax.ShapeDtypeStruct((Mp, C), out_dtype),
        grid=(Mp // tm,),
        in_specs=[pl.BlockSpec((tm, C), lambda i: (i, 0)),
                  pl.BlockSpec((1, C), lambda i: (0, 0)),
                  pl.BlockSpec((1, C), lambda i: (0, 0))],
        out_specs=pl.BlockSpec((tm, C), lambda i: (i, 0)),
        compiler_params=pltpu.CompilerParams(
            dimension_semantics=("parallel",)),
    )(xp, g.reshape(1, C).astype(jnp.float32), b.reshape(1, C).astype(jnp.float32))
    return out[:M] if Mp != M else out


def linear(x, w, b=None, *, activation="none", residual=None,
           transpose_rhs=False, out_dtype=jnp.float32, full_m=False):
    """y = act(x @ w [+ b]) [+ residual], tiled/pipelined bf16 MXU matmul."""
    M, K = x.shape
    N = w.shape[0] if transpose_rhs else w.shape[1]

    if full_m and M <= 1024:
        # lm_head-style call: one i-block so the weight streams from HBM once.
        Mp = _round_up(M, 8)
        tm = Mp
    else:
        tm, Mp = _pick_tile(M, (512, 256, 128))
    tn, Np = _pick_tile(N, (1024, 512, 256, 128))
    tk, Kp = _pick_tile(K, (512, 256, 128))

    xb = _pad2d(x.astype(jnp.bfloat16), Mp, Kp)
    wb = w.astype(jnp.bfloat16)
    wb = _pad2d(wb, Np, Kp) if transpose_rhs else _pad2d(wb, Kp, Np)

    in_specs = [
        pl.BlockSpec((tm, tk), lambda i, j, k: (i, k)),
        (pl.BlockSpec((tn, tk), lambda i, j, k: (j, k)) if transpose_rhs
         else pl.BlockSpec((tk, tn), lambda i, j, k: (k, j))),
    ]
    operands = [xb, wb]

    has_bias = b is not None
    if has_bias:
        operands.append(_pad2d(b.reshape(1, N).astype(jnp.float32), 1, Np))
        in_specs.append(pl.BlockSpec((1, tn), lambda i, j, k: (0, j)))

    has_residual = residual is not None
    if has_residual:
        operands.append(_pad2d(residual, Mp, Np))   # keep residual in its own (bf16) dtype
        in_specs.append(pl.BlockSpec((tm, tn), lambda i, j, k: (i, j)))

    # Scoped-VMEM budget: double-buffered blocks + f32 accumulator + headroom.
    out_isize = jnp.dtype(out_dtype).itemsize
    est = (2 * tm * tk * 2 + 2 * tk * tn * 2 + 2 * tm * tn * out_isize
           + (2 * tn * 4 if has_bias else 0)
           + (2 * tm * tn * residual.dtype.itemsize if has_residual else 0)
           + tm * tn * 4)
    vmem_limit = int(min(96 * 2 ** 20, max(32 * 2 ** 20, 2 * est)))

    kernel = functools.partial(
        _linear_kernel, activation=activation, transpose_rhs=transpose_rhs,
        has_bias=has_bias, has_residual=has_residual)

    out = pl.pallas_call(
        kernel,
        out_shape=jax.ShapeDtypeStruct((Mp, Np), out_dtype),
        grid=(Mp // tm, Np // tn, Kp // tk),
        in_specs=in_specs,
        out_specs=pl.BlockSpec((tm, tn), lambda i, j, k: (i, j)),
        scratch_shapes=[pltpu.VMEM((tm, tn), jnp.float32)],
        compiler_params=pltpu.CompilerParams(
            dimension_semantics=("parallel", "parallel", "arbitrary"),
            vmem_limit_bytes=vmem_limit),
    )(*operands)
    if (Mp, Np) != (M, N):
        out = out[:M, :N]
    return out


def flash_attention(qkv, n_head, n_embd):
    """Causal multi-head attention on the fused qkv buffer: qkv is (B, T, 3C)."""
    B, T, _ = qkv.shape
    C = n_embd
    d_head = C // n_head
    tq, Tp = _pick_tile(T, (128,))
    tkv = tq                                       # equal tiles -> only diag block masked

    if Tp != T:
        qkv = jnp.pad(qkv, ((0, 0), (0, Tp - T), (0, 0)))
    qkv = qkv.astype(jnp.bfloat16)

    # K/V index_map: skipped (future) kv blocks map to the last valid block index,
    # so Pallas dedups the DMA instead of fetching masked-out tiles.
    if C % 128 == 0:
        # Lane-offset views of the fused qkv buffer — no JAX-side slice copies.
        ops = (qkv, qkv, qkv)
        in_specs = [
            pl.BlockSpec((1, tq, C), lambda b, i, j: (b, i, 0)),
            pl.BlockSpec((1, tkv, C), lambda b, i, j: (b, jnp.minimum(j, i), 1)),
            pl.BlockSpec((1, tkv, C), lambda b, i, j: (b, jnp.minimum(j, i), 2)),
        ]
    else:
        # Small/unaligned C (toy config): split q/k/v in JAX, full-C blocks.
        ops = (qkv[..., :C], qkv[..., C:2 * C], qkv[..., 2 * C:])
        in_specs = [
            pl.BlockSpec((1, tq, C), lambda b, i, j: (b, i, 0)),
            pl.BlockSpec((1, tkv, C), lambda b, i, j: (b, jnp.minimum(j, i), 0)),
            pl.BlockSpec((1, tkv, C), lambda b, i, j: (b, jnp.minimum(j, i), 0)),
        ]

    kernel = functools.partial(
        _flash_attn_kernel, n_head=n_head, d_head=d_head, tq=tq, tkv=tkv)

    out = pl.pallas_call(
        kernel,
        out_shape=jax.ShapeDtypeStruct((B, Tp, C), jnp.bfloat16),
        grid=(B, Tp // tq, Tp // tkv),
        in_specs=in_specs,
        out_specs=pl.BlockSpec((1, tq, C), lambda b, i, j: (b, i, 0)),
        scratch_shapes=[pltpu.VMEM((n_head, tq, 1), jnp.float32),       # m
                        pltpu.VMEM((n_head, tq, 1), jnp.float32),       # l
                        pltpu.VMEM((n_head, tq, d_head), jnp.float32)],  # acc (lane-0 aligned)
        compiler_params=pltpu.CompilerParams(
            dimension_semantics=("parallel", "parallel", "arbitrary")),
    )(*ops)
    return out[:, :T] if Tp != T else out


# --------------------------- parameter creation -------------------------------

def init_params(key, cfg):
    C, V, L, H = cfg["n_embd"], cfg["vocab_size"], cfg["n_layer"], cfg["n_head"]
    d_head = C // H
    q_scale = 1.0 / math.sqrt(d_head)
    std = 0.02
    std_proj = std * (2 * L) ** -0.5
    Vp = _round_up(V, 128)                 # pad vocab once at init; extra rows never indexed
    keys = iter(jax.random.split(key, 2 + 6 * L))

    def nrm(shape, s):
        return (s * jax.random.normal(next(keys), shape, jnp.float32)
                ).astype(jnp.bfloat16)

    wte = nrm((V, C), std)                 # tied with lm_head (used transposed)
    if Vp != V:
        wte = jnp.pad(wte, ((0, Vp - V), (0, 0)))

    params = {
        "wte": wte,
        "wpe": nrm((cfg["block_size"], C), std),
        "ln_f_g": jnp.ones((C,), jnp.float32),
        "ln_f_b": jnp.zeros((C,), jnp.float32),
        "h": [],
    }
    for _ in range(L):
        wq, wk, wv = nrm((C, C), std), nrm((C, C), std), nrm((C, C), std)
        # Fused c_attn weight; fold the 1/sqrt(d_head) softmax scale into the q
        # columns (linear, so the forward output is unchanged; zero runtime cost).
        w_qkv = jnp.concatenate(
            [(wq.astype(jnp.float32) * q_scale).astype(jnp.bfloat16), wk, wv], axis=1)
        params["h"].append({
            "ln1_g": jnp.ones((C,), jnp.float32),
            "ln1_b": jnp.zeros((C,), jnp.float32),
            "w_qkv": w_qkv,                                   # (C, 3C)
            "b_qkv": jnp.zeros((3 * C,), jnp.float32),
            "attn_proj_w": nrm((C, C), std_proj),
            "attn_proj_b": jnp.zeros((C,), jnp.float32),
            "ln2_g": jnp.ones((C,), jnp.float32),
            "ln2_b": jnp.zeros((C,), jnp.float32),
            "fc_w": nrm((C, 4 * C), std),
            "fc_b": jnp.zeros((4 * C,), jnp.float32),
            "mlp_proj_w": nrm((4 * C, C), std_proj),
            "mlp_proj_b": jnp.zeros((C,), jnp.float32),
        })
    return params


# ------------------------------ forward pass ----------------------------------

def gpt_forward(params, idx, cfg):
    B, T = idx.shape
    C, H, V = cfg["n_embd"], cfg["n_head"], cfg["vocab_size"]
    assert T <= cfg["block_size"]

    # Embedding gathers are plain-JAX glue; residual stream carried in bf16.
    tok = jnp.take(params["wte"], idx, axis=0)                         # (B,T,C) bf16
    pos = params["wpe"][:T]                                            # (T,C)   bf16
    x = (tok + pos[None]).reshape(B * T, C).astype(jnp.bfloat16)

    for layer in params["h"]:
        # --- attention sub-block: LN -> fused qkv matmul -> flash attn -> proj+residual ---
        h = layernorm(x, layer["ln1_g"], layer["ln1_b"])
        qkv = linear(h, layer["w_qkv"], layer["b_qkv"], out_dtype=jnp.bfloat16)  # (M, 3C)
        y = flash_attention(qkv.reshape(B, T, 3 * C), H, C)                      # (B,T,C) bf16
        x = linear(y.reshape(B * T, C), layer["attn_proj_w"],
                   layer["attn_proj_b"], residual=x, out_dtype=jnp.bfloat16)

        # --- MLP sub-block: LN -> fc+gelu -> proj+residual ---
        h = layernorm(x, layer["ln2_g"], layer["ln2_b"])
        h = linear(h, layer["fc_w"], layer["fc_b"],
                   activation="gelu_tanh", out_dtype=jnp.bfloat16)
        x = linear(h, layer["mlp_proj_w"], layer["mlp_proj_b"],
                   residual=x, out_dtype=jnp.bfloat16)

    h = layernorm(x, params["ln_f_g"], params["ln_f_b"])
    # lm_head: weight tied to wte, contracted transposed in-kernel; full-M tiling
    # so the (Vp, C) tied weight is streamed from HBM exactly once.
    logits = linear(h, params["wte"], None, transpose_rhs=True,
                    full_m=True, out_dtype=jnp.float32)
    if logits.shape[1] != V:
        logits = logits[:, :V]
    # TODO(synk): targets/cross-entropy path not implemented (forward called with targets=None).
    return logits.reshape(B, T, V), None


# ---------------------------------- main --------------------------------------

if __name__ == "__main__":
    cfg = dict(block_size=16, vocab_size=256, n_layer=2, n_head=4, n_embd=32)

    key = jax.random.PRNGKey(0)
    pkey, ikey = jax.random.split(key)
    params = init_params(pkey, cfg)

    B, T = 2, 8
    idx = jax.random.randint(ikey, (B, T), 0, cfg["vocab_size"], dtype=jnp.int32)

    logits, loss = jax.jit(functools.partial(gpt_forward, cfg=cfg))(params, idx)
    jax.block_until_ready(logits)
    assert logits.shape == (B, T, cfg["vocab_size"])
    assert loss is None
    print("KERNEL_OK")
</pallas_src>

<mosaic_0001>
module attributes {stable_mosaic.version = 11 : i64} {
  func.func @_layernorm_kernel(%arg0: i32, %arg1: memref<16x32xbf16, #tpu.memory_space<vmem>>, %arg2: memref<1x32xf32, #tpu.memory_space<vmem>>, %arg3: memref<1x32xf32, #tpu.memory_space<vmem>>, %arg4: memref<16x32xbf16, #tpu.memory_space<vmem>>) attributes {dimension_semantics = [#tpu.dimension_semantics<parallel>], iteration_bounds = array<i64: 1>, scalar_prefetch = 0 : i64, scratch_operands = 0 : i64, tpu.core_type = #tpu.core_type<tc>, window_params = [{transform_indices = @transform_0, window_bounds = array<i64: 16, 32>}, {pipeline_mode = #tpu.pipeline_mode<synchronous>, transform_indices = @transform_1, window_bounds = array<i64: 1, 32>}, {pipeline_mode = #tpu.pipeline_mode<synchronous>, transform_indices = @transform_2, window_bounds = array<i64: 1, 32>}, {transform_indices = @transform_3, window_bounds = array<i64: 16, 32>}]} {
    %c0 = arith.constant 0 : index
    %c0_0 = arith.constant 0 : index
    %0 = vector.load %arg1[%c0, %c0_0] : memref<16x32xbf16, #tpu.memory_space<vmem>>, vector<16x32xbf16>
    %1 = arith.extf %0 : vector<16x32xbf16> to vector<16x32xf32>
    %cst = arith.constant dense<0.000000e+00> : vector<16xf32>
    %2 = vector.multi_reduction <add>, %1, %cst [1] : vector<16x32xf32> to vector<16xf32>
    %3 = vector.shape_cast %2 : vector<16xf32> to vector<16x1xf32>
    %cst_1 = arith.constant 3.200000e+01 : f32
    %4 = vector.broadcast %cst_1 : f32 to vector<16x1xf32>
    %5 = arith.divf %3, %4 : vector<16x1xf32>
    %6 = arith.mulf %1, %1 : vector<16x32xf32>
    %cst_2 = arith.constant dense<0.000000e+00> : vector<16xf32>
    %7 = vector.multi_reduction <add>, %6, %cst_2 [1] : vector<16x32xf32> to vector<16xf32>
    %8 = vector.shape_cast %7 : vector<16xf32> to vector<16x1xf32>
    %cst_3 = arith.constant 3.200000e+01 : f32
    %9 = vector.broadcast %cst_3 : f32 to vector<16x1xf32>
    %10 = arith.divf %8, %9 : vector<16x1xf32>
    %11 = arith.mulf %5, %5 : vector<16x1xf32>
    %12 = arith.subf %10, %11 : vector<16x1xf32>
    %13 = vector.broadcast %5 : vector<16x1xf32> to vector<16x32xf32>
    %14 = arith.subf %1, %13 : vector<16x32xf32>
    %cst_4 = arith.constant 9.99999974E-6 : f32
    %15 = vector.broadcast %cst_4 : f32 to vector<16x1xf32>
    %16 = arith.addf %12, %15 : vector<16x1xf32>
    %17 = math.rsqrt %16 : vector<16x1xf32>
    %18 = vector.broadcast %17 : vector<16x1xf32> to vector<16x32xf32>
    %19 = arith.mulf %14, %18 : vector<16x32xf32>
    %c0_5 = arith.constant 0 : index
    %c0_6 = arith.constant 0 : index
    %20 = vector.load %arg2[%c0_5, %c0_6] : memref<1x32xf32, #tpu.memory_space<vmem>>, vector<1x32xf32>
    %21 = vector.broadcast %20 : vector<1x32xf32> to vector<16x32xf32>
    %22 = arith.mulf %19, %21 : vector<16x32xf32>
    %c0_7 = arith.constant 0 : index
    %c0_8 = arith.constant 0 : index
    %23 = vector.load %arg3[%c0_7, %c0_8] : memref<1x32xf32, #tpu.memory_space<vmem>>, vector<1x32xf32>
    %24 = vector.broadcast %23 : vector<1x32xf32> to vector<16x32xf32>
    %25 = arith.addf %22, %24 : vector<16x32xf32>
    %26 = arith.truncf %25 : vector<16x32xf32> to vector<16x32xbf16>
    %c0_9 = arith.constant 0 : index
    %c0_10 = arith.constant 0 : index
    %27 = vector.load %arg4[%c0_9, %c0_10] : memref<16x32xbf16, #tpu.memory_space<vmem>>, vector<16x32xbf16>
    tpu.vector_store %arg4[%c0_9, %c0_10], %26 {strides = array<i32>} : memref<16x32xbf16, #tpu.memory_space<vmem>>, vector<16x32xbf16>,
    return
  }
  func.func @transform_0(%arg0: i32) -> (i32, i32) {
    %c0_i32 = arith.constant 0 : i32
    %c0_i32_0 = arith.constant 0 : i32
    return %arg0, %c0_i32 : i32, i32
  }
  func.func @transform_1(%arg0: i32) -> (i32, i32) {
    %c0_i32 = arith.constant 0 : i32
    %c0_i32_0 = arith.constant 0 : i32
    %c0_i32_1 = arith.constant 0 : i32
    return %c0_i32, %c0_i32_0 : i32, i32
  }
  func.func @transform_2(%arg0: i32) -> (i32, i32) {
    %c0_i32 = arith.constant 0 : i32
    %c0_i32_0 = arith.constant 0 : i32
    %c0_i32_1 = arith.constant 0 : i32
    return %c0_i32, %c0_i32_0 : i32, i32
  }
  func.func @transform_3(%arg0: i32) -> (i32, i32) {
    %c0_i32 = arith.constant 0 : i32
    %c0_i32_0 = arith.constant 0 : i32
    return %arg0, %c0_i32 : i32, i32
  }
}

module attributes {stable_mosaic.version = 11 : i64} {
  func.func @_linear_kernel(%arg0: i32, %arg1: i32, %arg2: i32, %arg3: memref<16x32xbf16, #tpu.memory_space<vmem>>, %arg4: memref<32x32xbf16, #tpu.memory_space<vmem>>, %arg5: memref<1x32xf32, #tpu.memory_space<vmem>>, %arg6: memref<16x32xbf16, #tpu.memory_space<vmem>>, %arg7: memref<16x32xbf16, #tpu.memory_space<vmem>>, %arg8: memref<16x32xf32, #tpu.memory_space<vmem>>) attributes {dimension_semantics = [#tpu.dimension_semantics<parallel>, #tpu.dimension_semantics<parallel>, #tpu.dimension_semantics<arbitrary>], iteration_bounds = array<i64: 1, 1, 1>, scalar_prefetch = 0 : i64, scratch_operands = 1 : i64, tpu.core_type = #tpu.core_type<tc>, window_params = [{transform_indices = @transform_0, window_bounds = array<i64: 16, 32>}, {transform_indices = @transform_1, window_bounds = array<i64: 32, 32>}, {transform_indices = @transform_2, window_bounds = array<i64: 1, 32>}, {transform_indices = @transform_3, window_bounds = array<i64: 16, 32>}, {transform_indices = @transform_4, window_bounds = array<i64: 16, 32>}]} {
    %c0_i32 = arith.constant 0 : i32
    %0 = arith.cmpi eq, %arg2, %c0_i32 : i32
    %1 = arith.extui %0 : i1 to i32
    %c0_i32_0 = arith.constant 0 : i32
    %2 = arith.cmpi ne, %1, %c0_i32_0 : i32
    scf.if %2 {
      %cst_10 = arith.constant 0.000000e+00 : f32
      %12 = vector.broadcast %cst_10 : f32 to vector<16x32xf32>
      %c0_11 = arith.constant 0 : index
      %c0_12 = arith.constant 0 : index
      %13 = vector.load %arg8[%c0_11, %c0_12] : memref<16x32xf32, #tpu.memory_space<vmem>>, vector<16x32xf32>
      tpu.vector_store %arg8[%c0_11, %c0_12], %12 {strides = array<i32>} : memref<16x32xf32, #tpu.memory_space<vmem>>, vector<16x32xf32>,
    } else {
    }
    %c0 = arith.constant 0 : index
    %c0_1 = arith.constant 0 : index
    %3 = vector.load %arg3[%c0, %c0_1] : memref<16x32xbf16, #tpu.memory_space<vmem>>, vector<16x32xbf16>
    %c0_2 = arith.constant 0 : index
    %c0_3 = arith.constant 0 : index
    %4 = vector.load %arg4[%c0_2, %c0_3] : memref<32x32xbf16, #tpu.memory_space<vmem>>, vector<32x32xbf16>
    %c0_4 = arith.constant 0 : index
    %c0_5 = arith.constant 0 : index
    %5 = vector.load %arg8[%c0_4, %c0_5] : memref<16x32xf32, #tpu.memory_space<vmem>>, vector<16x32xf32>
    %cst = arith.constant dense<0.000000e+00> : vector<16x32xf32>
    %6 = tpu.matmul %3, %4, %cst {dimension_numbers = #tpu.dot_dimension_numbers<[1], [0], [0], [1], [0, 0, 1, 1], [], []>} : vector<16x32xbf16>, vector<32x32xbf16>, vector<16x32xf32> -> vector<16x32xf32>
    %7 = arith.addf %5, %6 : vector<16x32xf32>
    %c0_6 = arith.constant 0 : index
    %c0_7 = arith.constant 0 : index
    %8 = vector.load %arg8[%c0_6, %c0_7] : memref<16x32xf32, #tpu.memory_space<vmem>>, vector<16x32xf32>
    tpu.vector_store %arg8[%c0_6, %c0_7], %7 {strides = array<i32>} : memref<16x32xf32, #tpu.memory_space<vmem>>, vector<16x32xf32>,
    %c0_i32_8 = arith.constant 0 : i32
    %9 = arith.cmpi eq, %arg2, %c0_i32_8 : i32
    %10 = arith.extui %9 : i1 to i32
    %c0_i32_9 = arith.constant 0 : i32
    %11 = arith.cmpi ne, %10, %c0_i32_9 : i32
    scf.if %11 {
      %c0_10 = arith.constant 0 : index
      %c0_11 = arith.constant 0 : index
      %12 = vector.load %arg8[%c0_10, %c0_11] : memref<16x32xf32, #tpu.memory_space<vmem>>, vector<16x32xf32>
      %c0_12 = arith.constant 0 : index
      %c0_13 = arith.constant 0 : index
      %13 = vector.load %arg5[%c0_12, %c0_13] : memref<1x32xf32, #tpu.memory_space<vmem>>, vector<1x32xf32>
      %14 = vector.broadcast %13 : vector<1x32xf32> to vector<16x32xf32>
      %15 = arith.addf %12, %14 : vector<16x32xf32>
      %c0_14 = arith.constant 0 : index
      %c0_15 = arith.constant 0 : index
      %16 = vector.load %arg6[%c0_14, %c0_15] : memref<16x32xbf16, #tpu.memory_space<vmem>>, vector<16x32xbf16>
      %17 = arith.extf %16 : vector<16x32xbf16> to vector<16x32xf32>
      %18 = arith.addf %15, %17 : vector<16x32xf32>
      %19 = arith.truncf %18 : vector<16x32xf32> to vector<16x32xbf16>
      %c0_16 = arith.constant 0 : index
      %c0_17 = arith.constant 0 : index
      %20 = vector.load %arg7[%c0_16, %c0_17] : memref<16x32xbf16, #tpu.memory_space<vmem>>, vector<16x32xbf16>
      tpu.vector_store %arg7[%c0_16, %c0_17], %19 {strides = array<i32>} : memref<16x32xbf16, #tpu.memory_space<vmem>>, vector<16x32xbf16>,
    } else {
    }
    return
  }
  func.func @transform_0(%arg0: i32, %arg1: i32, %arg2: i32) -> (i32, i32) {
    %c0_i32 = arith.constant 0 : i32
    return %arg0, %arg2 : i32, i32
  }
  func.func @transform_1(%arg0: i32, %arg1: i32, %arg2: i32) -> (i32, i32) {
    %c0_i32 = arith.constant 0 : i32
    return %arg2, %arg1 : i32, i32
  }
  func.func @transform_2(%arg0: i32, %arg1: i32, %arg2: i32) -> (i32, i32) {
    %c0_i32 = arith.constant 0 : i32
    %c0_i32_0 = arith.constant 0 : i32
    return %c0_i32, %arg1 : i32, i32
  }
  func.func @transform_3(%arg0: i32, %arg1: i32, %arg2: i32) -> (i32, i32) {
    %c0_i32 = arith.constant 0 : i32
    return %arg0, %arg1 : i32, i32
  }
  func.func @transform_4(%arg0: i32, %arg1: i32, %arg2: i32) -> (i32, i32) {
    %c0_i32 = arith.constant 0 : i32
    return %arg0, %arg1 : i32, i32
  }
}

module attributes {stable_mosaic.version = 11 : i64} {
  func.func @_linear_kernel(%arg0: i32, %arg1: i32, %arg2: i32, %arg3: memref<16x32xbf16, #tpu.memory_space<vmem>>, %arg4: memref<32x96xbf16, #tpu.memory_space<vmem>>, %arg5: memref<1x96xf32, #tpu.memory_space<vmem>>, %arg6: memref<16x96xbf16, #tpu.memory_space<vmem>>, %arg7: memref<16x96xf32, #tpu.memory_space<vmem>>) attributes {dimension_semantics = [#tpu.dimension_semantics<parallel>, #tpu.dimension_semantics<parallel>, #tpu.dimension_semantics<arbitrary>], iteration_bounds = array<i64: 1, 1, 1>, scalar_prefetch = 0 : i64, scratch_operands = 1 : i64, tpu.core_type = #tpu.core_type<tc>, window_params = [{transform_indices = @transform_0, window_bounds = array<i64: 16, 32>}, {transform_indices = @transform_1, window_bounds = array<i64: 32, 96>}, {transform_indices = @transform_2, window_bounds = array<i64: 1, 96>}, {transform_indices = @transform_3, window_bounds = array<i64: 16, 96>}]} {
    %c0_i32 = arith.constant 0 : i32
    %0 = arith.cmpi eq, %arg2, %c0_i32 : i32
    %1 = arith.extui %0 : i1 to i32
    %c0_i32_0 = arith.constant 0 : i32
    %2 = arith.cmpi ne, %1, %c0_i32_0 : i32
    scf.if %2 {
      %cst_10 = arith.constant 0.000000e+00 : f32
      %12 = vector.broadcast %cst_10 : f32 to vector<16x96xf32>
      %c0_11 = arith.constant 0 : index
      %c0_12 = arith.constant 0 : index
      %13 = vector.load %arg7[%c0_11, %c0_12] : memref<16x96xf32, #tpu.memory_space<vmem>>, vector<16x96xf32>
      tpu.vector_store %arg7[%c0_11, %c0_12], %12 {strides = array<i32>} : memref<16x96xf32, #tpu.memory_space<vmem>>, vector<16x96xf32>,
    } else {
    }
    %c0 = arith.constant 0 : index
    %c0_1 = arith.constant 0 : index
    %3 = vector.load %arg3[%c0, %c0_1] : memref<16x32xbf16, #tpu.memory_space<vmem>>, vector<16x32xbf16>
    %c0_2 = arith.constant 0 : index
    %c0_3 = arith.constant 0 : index
    %4 = vector.load %arg4[%c0_2, %c0_3] : memref<32x96xbf16, #tpu.memory_space<vmem>>, vector<32x96xbf16>
    %c0_4 = arith.constant 0 : index
    %c0_5 = arith.constant 0 : index
    %5 = vector.load %arg7[%c0_4, %c0_5] : memref<16x96xf32, #tpu.memory_space<vmem>>, vector<16x96xf32>
    %cst = arith.constant dense<0.000000e+00> : vector<16x96xf32>
    %6 = tpu.matmul %3, %4, %cst {dimension_numbers = #tpu.dot_dimension_numbers<[1], [0], [0], [1], [0, 0, 1, 1], [], []>} : vector<16x32xbf16>, vector<32x96xbf16>, vector<16x96xf32> -> vector<16x96xf32>
    %7 = arith.addf %5, %6 : vector<16x96xf32>
    %c0_6 = arith.constant 0 : index
    %c0_7 = arith.constant 0 : index
    %8 = vector.load %arg7[%c0_6, %c0_7] : memref<16x96xf32, #tpu.memory_space<vmem>>, vector<16x96xf32>
    tpu.vector_store %arg7[%c0_6, %c0_7], %7 {strides = array<i32>} : memref<16x96xf32, #tpu.memory_space<vmem>>, vector<16x96xf32>,
    %c0_i32_8 = arith.constant 0 : i32
    %9 = arith.cmpi eq, %arg2, %c0_i32_8 : i32
    %10 = arith.extui %9 : i1 to i32
    %c0_i32_9 = arith.constant 0 : i32
    %11 = arith.cmpi ne, %10, %c0_i32_9 : i32
    scf.if %11 {
      %c0_10 = arith.constant 0 : index
      %c0_11 = arith.constant 0 : index
      %12 = vector.load %arg7[%c0_10, %c0_11] : memref<16x96xf32, #tpu.memory_space<vmem>>, vector<16x96xf32>
      %c0_12 = arith.constant 0 : index
      %c0_13 = arith.constant 0 : index
      %13 = vector.load %arg5[%c0_12, %c0_13] : memref<1x96xf32, #tpu.memory_space<vmem>>, vector<1x96xf32>
      %14 = vector.broadcast %13 : vector<1x96xf32> to vector<16x96xf32>
      %15 = arith.addf %12, %14 : vector<16x96xf32>
      %16 = arith.truncf %15 : vector<16x96xf32> to vector<16x96xbf16>
      %c0_14 = arith.constant 0 : index
      %c0_15 = arith.constant 0 : index
      %17 = vector.load %arg6[%c0_14, %c0_15] : memref<16x96xbf16, #tpu.memory_space<vmem>>, vector<16x96xbf16>
      tpu.vector_store %arg6[%c0_14, %c0_15], %16 {strides = array<i32>} : memref<16x96xbf16, #tpu.memory_space<vmem>>, vector<16x96xbf16>,
    } else {
    }
    return
  }
  func.func @transform_0(%arg0: i32, %arg1: i32, %arg2: i32) -> (i32, i32) {
    %c0_i32 = arith.constant 0 : i32
    return %arg0, %arg2 : i32, i32
  }
  func.func @transform_1(%arg0: i32, %arg1: i32, %arg2: i32) -> (i32, i32) {
    %c0_i32 = arith.constant 0 : i32
    return %arg2, %arg1 : i32, i32
  }
  func.func @transform_2(%arg0: i32, %arg1: i32, %arg2: i32) -> (i32, i32) {
    %c0_i32 = arith.constant 0 : i32
    %c0_i32_0 = arith.constant 0 : i32
    return %c0_i32, %arg1 : i32, i32
  }
  func.func @transform_3(%arg0: i32, %arg1: i32, %arg2: i32) -> (i32, i32) {
    %c0_i32 = arith.constant 0 : i32
    return %arg0, %arg1 : i32, i32
  }
}

module attributes {stable_mosaic.version = 11 : i64} {
  func.func @_flash_attn_kernel(%arg0: i32, %arg1: i32, %arg2: i32, %arg3: memref<1x8x32xbf16, #tpu.memory_space<vmem>>, %arg4: memref<1x8x32xbf16, #tpu.memory_space<vmem>>, %arg5: memref<1x8x32xbf16, #tpu.memory_space<vmem>>, %arg6: memref<1x8x32xbf16, #tpu.memory_space<vmem>>, %arg7: memref<4x8x1xf32, #tpu.memory_space<vmem>>, %arg8: memref<4x8x1xf32, #tpu.memory_space<vmem>>, %arg9: memref<4x8x8xf32, #tpu.memory_space<vmem>>) attributes {dimension_semantics = [#tpu.dimension_semantics<parallel>, #tpu.dimension_semantics<parallel>, #tpu.dimension_semantics<arbitrary>], iteration_bounds = array<i64: 2, 1, 1>, scalar_prefetch = 0 : i64, scratch_operands = 3 : i64, tpu.core_type = #tpu.core_type<tc>, window_params = [{transform_indices = @transform_0, window_bounds = array<i64: 1, 8, 32>}, {transform_indices = @transform_1, window_bounds = array<i64: 1, 8, 32>}, {transform_indices = @transform_2, window_bounds = array<i64: 1, 8, 32>}, {transform_indices = @transform_3, window_bounds = array<i64: 1, 8, 32>}]} {
    %c0_i32 = arith.constant 0 : i32
    %0 = arith.cmpi eq, %arg2, %c0_i32 : i32
    %1 = arith.extui %0 : i1 to i32
    %c0_i32_0 = arith.constant 0 : i32
    %2 = arith.cmpi ne, %1, %c0_i32_0 : i32
    scf.if %2 {
      %cst = arith.constant -1.000000e+30 : f32
      %12 = vector.broadcast %cst : f32 to vector<4x8x1xf32>
      %c0 = arith.constant 0 : index
      %c0_5 = arith.constant 0 : index
      %c0_6 = arith.constant 0 : index
      %13 = vector.load %arg7[%c0, %c0_5, %c0_6] : memref<4x8x1xf32, #tpu.memory_space<vmem>>, vector<4x8x1xf32>
      tpu.vector_store %arg7[%c0, %c0_5, %c0_6], %12 {strides = array<i32>} : memref<4x8x1xf32, #tpu.memory_space<vmem>>, vector<4x8x1xf32>,
      %cst_7 = arith.constant 0.000000e+00 : f32
      %14 = vector.broadcast %cst_7 : f32 to vector<4x8x1xf32>
      %c0_8 = arith.constant 0 : index
      %c0_9 = arith.constant 0 : index
      %c0_10 = arith.constant 0 : index
      %15 = vector.load %arg8[%c0_8, %c0_9, %c0_10] : memref<4x8x1xf32, #tpu.memory_space<vmem>>, vector<4x8x1xf32>
      tpu.vector_store %arg8[%c0_8, %c0_9, %c0_10], %14 {strides = array<i32>} : memref<4x8x1xf32, #tpu.memory_space<vmem>>, vector<4x8x1xf32>,
      %cst_11 = arith.constant 0.000000e+00 : f32
      %16 = vector.broadcast %cst_11 : f32 to vector<4x8x8xf32>
      %c0_12 = arith.constant 0 : index
      %c0_13 = arith.constant 0 : index
      %c0_14 = arith.constant 0 : index
      %17 = vector.load %arg9[%c0_12, %c0_13, %c0_14] : memref<4x8x8xf32, #tpu.memory_space<vmem>>, vector<4x8x8xf32>
      tpu.vector_store %arg9[%c0_12, %c0_13, %c0_14], %16 {strides = array<i32>} : memref<4x8x8xf32, #tpu.memory_space<vmem>>, vector<4x8x8xf32>,
    } else {
    }
    %3 = arith.cmpi slt, %arg2, %arg1 : i32
    %4 = arith.extui %3 : i1 to i32
    %c0_i32_1 = arith.constant 0 : i32
    %5 = arith.cmpi ne, %4, %c0_i32_1 : i32
    scf.if %5 {
      %c0 = arith.constant 0 : index
      %c0_5 = arith.constant 0 : index
      %c0_6 = arith.constant 0 : index
      %12 = vector.load %arg3[%c0, %c0_5, %c0_6] : memref<1x8x32xbf16, #tpu.memory_space<vmem>>, vector<1x8x8xbf16>
      %13 = vector.shape_cast %12 : vector<1x8x8xbf16> to vector<8x8xbf16>
      %c0_7 = arith.constant 0 : index
      %c0_8 = arith.constant 0 : index
      %c0_9 = arith.constant 0 : index
      %14 = vector.load %arg4[%c0_7, %c0_8, %c0_9] : memref<1x8x32xbf16, #tpu.memory_space<vmem>>, vector<1x8x8xbf16>
      %15 = vector.shape_cast %14 : vector<1x8x8xbf16> to vector<8x8xbf16>
      %c0_10 = arith.constant 0 : index
      %c0_11 = arith.constant 0 : index
      %c0_12 = arith.constant 0 : index
      %16 = vector.load %arg5[%c0_10, %c0_11, %c0_12] : memref<1x8x32xbf16, #tpu.memory_space<vmem>>, vector<1x8x8xbf16>
      %17 = vector.shape_cast %16 : vector<1x8x8xbf16> to vector<8x8xbf16>
      %cst = arith.constant dense<0.000000e+00> : vector<8x8xf32>
      %18 = tpu.matmul %13, %15, %cst {dimension_numbers = #tpu.dot_dimension_numbers<[1], [1], [0], [0], [0, 0, 1, 0], [], []>} : vector<8x8xbf16>, vector<8x8xbf16>, vector<8x8xf32> -> vector<8x8xf32>
      %c0_13 = arith.constant 0 : index
      %c0_14 = arith.constant 0 : index
      %c0_15 = arith.constant 0 : index
      %19 = vector.load %arg7[%c0_13, %c0_14, %c0_15] : memref<4x8x1xf32, #tpu.memory_space<vmem>>, vector<1x8x1xf32>
      %20 = vector.shape_cast %19 : vector<1x8x1xf32> to vector<8x1xf32>
      %cst_16 = arith.constant dense<0xFF800000> : vector<8xf32>
      %21 = vector.multi_reduction <maximumf>, %18, %cst_16 [1] : vector<8x8xf32> to vector<8xf32>
      %22 = vector.shape_cast %21 : vector<8xf32> to vector<8x1xf32>
      %23 = arith.maximumf %20, %22 : vector<8x1xf32>
      %24 = arith.subf %20, %23 : vector<8x1xf32>
      %25 = math.exp %24 : vector<8x1xf32>
      %26 = vector.broadcast %23 : vector<8x1xf32> to vector<8x8xf32>
      %27 = arith.subf %18, %26 : vector<8x8xf32>
      %28 = math.exp %27 : vector<8x8xf32>
      %c0_17 = arith.constant 0 : index
      %c0_18 = arith.constant 0 : index
      %c0_19 = arith.constant 0 : index
      %29 = vector.load %arg8[%c0_17, %c0_18, %c0_19] : memref<4x8x1xf32, #tpu.memory_space<vmem>>, vector<1x8x1xf32>
      %30 = vector.shape_cast %29 : vector<1x8x1xf32> to vector<8x1xf32>
      %31 = arith.mulf %25, %30 : vector<8x1xf32>
      %cst_20 = arith.constant dense<0.000000e+00> : vector<8xf32>
      %32 = vector.multi_reduction <add>, %28, %cst_20 [1] : vector<8x8xf32> to vector<8xf32>
      %33 = vector.shape_cast %32 : vector<8xf32> to vector<8x1xf32>
      %34 = arith.addf %31, %33 : vector<8x1xf32>
      %c0_21 = arith.constant 0 : index
      %c0_22 = arith.constant 0 : index
      %c0_23 = arith.constant 0 : index
      %35 = vector.load %arg8[%c0_21, %c0_22, %c0_23] : memref<4x8x1xf32, #tpu.memory_space<vmem>>, vector<1x8x1xf32>
      %36 = vector.shape_cast %35 : vector<1x8x1xf32> to vector<8x1xf32>
      %37 = vector.shape_cast %34 : vector<8x1xf32> to vector<1x8x1xf32>
      tpu.vector_store %arg8[%c0_21, %c0_22, %c0_23], %37 {strides = array<i32>} : memref<4x8x1xf32, #tpu.memory_space<vmem>>, vector<1x8x1xf32>,
      %c0_24 = arith.constant 0 : index
      %c0_25 = arith.constant 0 : index
      %c0_26 = arith.constant 0 : index
      %38 = vector.load %arg9[%c0_24, %c0_25, %c0_26] : memref<4x8x8xf32, #tpu.memory_space<vmem>>, vector<1x8x8xf32>
      %39 = vector.shape_cast %38 : vector<1x8x8xf32> to vector<8x8xf32>
      %40 = vector.broadcast %25 : vector<8x1xf32> to vector<8x8xf32>
      %41 = arith.mulf %40, %39 : vector<8x8xf32>
      %42 = arith.truncf %28 : vector<8x8xf32> to vector<8x8xbf16>
      %cst_27 = arith.constant dense<0.000000e+00> : vector<8x8xf32>
      %43 = tpu.matmul %42, %17, %cst_27 {dimension_numbers = #tpu.dot_dimension_numbers<[1], [0], [0], [1], [0, 0, 1, 1], [], []>} : vector<8x8xbf16>, vector<8x8xbf16>, vector<8x8xf32> -> vector<8x8xf32>
      %44 = arith.addf %41, %43 : vector<8x8xf32>
      %c0_28 = arith.constant 0 : index
      %c0_29 = arith.constant 0 : index
      %c0_30 = arith.constant 0 : index
      %45 = vector.load %arg9[%c0_28, %c0_29, %c0_30] : memref<4x8x8xf32, #tpu.memory_space<vmem>>, vector<1x8x8xf32>
      %46 = vector.shape_cast %45 : vector<1x8x8xf32> to vector<8x8xf32>
      %47 = vector.shape_cast %44 : vector<8x8xf32> to vector<1x8x8xf32>
      tpu.vector_store %arg9[%c0_28, %c0_29, %c0_30], %47 {strides = array<i32>} : memref<4x8x8xf32, #tpu.memory_space<vmem>>, vector<1x8x8xf32>,
      %c0_31 = arith.constant 0 : index
      %c0_32 = arith.constant 0 : index
      %c0_33 = arith.constant 0 : index
      %48 = vector.load %arg7[%c0_31, %c0_32, %c0_33] : memref<4x8x1xf32, #tpu.memory_space<vmem>>, vector<1x8x1xf32>
      %49 = vector.shape_cast %48 : vector<1x8x1xf32> to vector<8x1xf32>
      %50 = vector.shape_cast %23 : vector<8x1xf32> to vector<1x8x1xf32>
      tpu.vector_store %arg7[%c0_31, %c0_32, %c0_33], %50 {strides = array<i32>} : memref<4x8x1xf32, #tpu.memory_space<vmem>>, vector<1x8x1xf32>,
      %c0_34 = arith.constant 0 : index
      %c0_35 = arith.constant 0 : index
      %c8 = arith.constant 8 : index
      %51 = vector.load %arg3[%c0_34, %c0_35, %c8] : memref<1x8x32xbf16, #tpu.memory_space<vmem>>, vector<1x8x8xbf16>
      %52 = vector.shape_cast %51 : vector<1x8x8xbf16> to vector<8x8xbf16>
      %c0_36 = arith.constant 0 : index
      %c0_37 = arith.constant 0 : index
      %c8_38 = arith.constant 8 : index
      %53 = vector.load %arg4[%c0_36, %c0_37, %c8_38] : memref<1x8x32xbf16, #tpu.memory_space<vmem>>, vector<1x8x8xbf16>
      %54 = vector.shape_cast %53 : vector<1x8x8xbf16> to vector<8x8xbf16>
      %c0_39 = arith.constant 0 : index
      %c0_40 = arith.constant 0 : index
      %c8_41 = arith.constant 8 : index
      %55 = vector.load %arg5[%c0_39, %c0_40, %c8_41] : memref<1x8x32xbf16, #tpu.memory_space<vmem>>, vector<1x8x8xbf16>
      %56 = vector.shape_cast %55 : vector<1x8x8xbf16> to vector<8x8xbf16>
      %cst_42 = arith.constant dense<0.000000e+00> : vector<8x8xf32>
      %57 = tpu.matmul %52, %54, %cst_42 {dimension_numbers = #tpu.dot_dimension_numbers<[1], [1], [0], [0], [0, 0, 1, 0], [], []>} : vector<8x8xbf16>, vector<8x8xbf16>, vector<8x8xf32> -> vector<8x8xf32>
      %c1 = arith.constant 1 : index
      %c0_43 = arith.constant 0 : index
      %c0_44 = arith.constant 0 : index
      %58 = vector.load %arg7[%c1, %c0_43, %c0_44] : memref<4x8x1xf32, #tpu.memory_space<vmem>>, vector<1x8x1xf32>
      %59 = vector.shape_cast %58 : vector<1x8x1xf32> to vector<8x1xf32>
      %cst_45 = arith.constant dense<0xFF800000> : vector<8xf32>
      %60 = vector.multi_reduction <maximumf>, %57, %cst_45 [1] : vector<8x8xf32> to vector<8xf32>
      %61 = vector.shape_cast %60 : vector<8xf32> to vector<8x1xf32>
      %62 = arith.maximumf %59, %61 : vector<8x1xf32>
      %63 = arith.subf %59, %62 : vector<8x1xf32>
      %64 = math.exp %63 : vector<8x1xf32>
      %65 = vector.broadcast %62 : vector<8x1xf32> to vector<8x8xf32>
      %66 = arith.subf %57, %65 : vector<8x8xf32>
      %67 = math.exp %66 : vector<8x8xf32>
      %c1_46 = arith.constant 1 : index
      %c0_47 = arith.constant 0 : index
      %c0_48 = arith.constant 0 : index
      %68 = vector.load %arg8[%c1_46, %c0_47, %c0_48] : memref<4x8x1xf32, #tpu.memory_space<vmem>>, vector<1x8x1xf32>
      %69 = vector.shape_cast %68 : vector<1x8x1xf32> to vector<8x1xf32>
      %70 = arith.mulf %64, %69 : vector<8x1xf32>
      %cst_49 = arith.constant dense<0.000000e+00> : vector<8xf32>
      %71 = vector.multi_reduction <add>, %67, %cst_49 [1] : vector<8x8xf32> to vector<8xf32>
      %72 = vector.shape_cast %71 : vector<8xf32> to vector<8x1xf32>
      %73 = arith.addf %70, %72 : vector<8x1xf32>
      %c1_50 = arith.constant 1 : index
      %c0_51 = arith.constant 0 : index
      %c0_52 = arith.constant 0 : index
      %74 = vector.load %arg8[%c1_50, %c0_51, %c0_52] : memref<4x8x1xf32, #tpu.memory_space<vmem>>, vector<1x8x1xf32>
      %75 = vector.shape_cast %74 : vector<1x8x1xf32> to vector<8x1xf32>
      %76 = vector.shape_cast %73 : vector<8x1xf32> to vector<1x8x1xf32>
      tpu.vector_store %arg8[%c1_50, %c0_51, %c0_52], %76 {strides = array<i32>} : memref<4x8x1xf32, #tpu.memory_space<vmem>>, vector<1x8x1xf32>,
      %c1_53 = arith.constant 1 : index
      %c0_54 = arith.constant 0 : index
      %c0_55 = arith.constant 0 : index
      %77 = vector.load %arg9[%c1_53, %c0_54, %c0_55] : memref<4x8x8xf32, #tpu.memory_space<vmem>>, vector<1x8x8xf32>
      %78 = vector.shape_cast %77 : vector<1x8x8xf32> to vector<8x8xf32>
      %79 = vector.broadcast %64 : vector<8x1xf32> to vector<8x8xf32>
      %80 = arith.mulf %79, %78 : vector<8x8xf32>
      %81 = arith.truncf %67 : vector<8x8xf32> to vector<8x8xbf16>
      %cst_56 = arith.constant dense<0.000000e+00> : vector<8x8xf32>
      %82 = tpu.matmul %81, %56, %cst_56 {dimension_numbers = #tpu.dot_dimension_numbers<[1], [0], [0], [1], [0, 0, 1, 1], [], []>} : vector<8x8xbf16>, vector<8x8xbf16>, vector<8x8xf32> -> vector<8x8xf32>
      %83 = arith.addf %80, %82 : vector<8x8xf32>
      %c1_57 = arith.constant 1 : index
      %c0_58 = arith.constant 0 : index
      %c0_59 = arith.constant 0 : index
      %84 = vector.load %arg9[%c1_57, %c0_58, %c0_59] : memref<4x8x8xf32, #tpu.memory_space<vmem>>, vector<1x8x8xf32>
      %85 = vector.shape_cast %84 : vector<1x8x8xf32> to vector<8x8xf32>
      %86 = vector.shape_cast %83 : vector<8x8xf32> to vector<1x8x8xf32>
      tpu.vector_store %arg9[%c1_57, %c0_58, %c0_59], %86 {strides = array<i32>} : memref<4x8x8xf32, #tpu.memory_space<vmem>>, vector<1x8x8xf32>,
      %c1_60 = arith.constant 1 : index
      %c0_61 = arith.constant 0 : index
      %c0_62 = arith.constant 0 : index
      %87 = vector.load %arg7[%c1_60, %c0_61, %c0_62] : memref<4x8x1xf32, #tpu.memory_space<vmem>>, vector<1x8x1xf32>
      %88 = vector.shape_cast %87 : vector<1x8x1xf32> to vector<8x1xf32>
      %89 = vector.shape_cast %62 : vector<8x1xf32> to vector<1x8x1xf32>
      tpu.vector_store %arg7[%c1_60, %c0_61, %c0_62], %89 {strides = array<i32>} : memref<4x8x1xf32, #tpu.memory_space<vmem>>, vector<1x8x1xf32>,
      %c0_63 = arith.constant 0 : index
      %c0_64 = arith.constant 0 : index
      %c16 = arith.constant 16 : index
      %90 = vector.load %arg3[%c0_63, %c0_64, %c16] : memref<1x8x32xbf16, #tpu.memory_space<vmem>>, vector<1x8x8xbf16>
      %91 = vector.shape_cast %90 : vector<1x8x8xbf16> to vector<8x8xbf16>
      %c0_65 = arith.constant 0 : index
      %c0_66 = arith.constant 0 : index
      %c16_67 = arith.constant 16 : index
      %92 = vector.load %arg4[%c0_65, %c0_66, %c16_67] : memref<1x8x32xbf16, #tpu.memory_space<vmem>>, vector<1x8x8xbf16>
      %93 = vector.shape_cast %92 : vector<1x8x8xbf16> to vector<8x8xbf16>
      %c0_68 = arith.constant 0 : index
      %c0_69 = arith.constant 0 : index
      %c16_70 = arith.constant 16 : index
      %94 = vector.load %arg5[%c0_68, %c0_69, %c16_70] : memref<1x8x32xbf16, #tpu.memory_space<vmem>>, vector<1x8x8xbf16>
      %95 = vector.shape_cast %94 : vector<1x8x8xbf16> to vector<8x8xbf16>
      %cst_71 = arith.constant dense<0.000000e+00> : vector<8x8xf32>
      %96 = tpu.matmul %91, %93, %cst_71 {dimension_numbers = #tpu.dot_dimension_numbers<[1], [1], [0], [0], [0, 0, 1, 0], [], []>} : vector<8x8xbf16>, vector<8x8xbf16>, vector<8x8xf32> -> vector<8x8xf32>
      %c2 = arith.constant 2 : index
      %c0_72 = arith.constant 0 : index
      %c0_73 = arith.constant 0 : index
      %97 = vector.load %arg7[%c2, %c0_72, %c0_73] : memref<4x8x1xf32, #tpu.memory_space<vmem>>, vector<1x8x1xf32>
      %98 = vector.shape_cast %97 : vector<1x8x1xf32> to vector<8x1xf32>
      %cst_74 = arith.constant dense<0xFF800000> : vector<8xf32>
      %99 = vector.multi_reduction <maximumf>, %96, %cst_74 [1] : vector<8x8xf32> to vector<8xf32>
      %100 = vector.shape_cast %99 : vector<8xf32> to vector<8x1xf32>
      %101 = arith.maximumf %98, %100 : vector<8x1xf32>
      %102 = arith.subf %98, %101 : vector<8x1xf32>
      %103 = math.exp %102 : vector<8x1xf32>
      %104 = vector.broadcast %101 : vector<8x1xf32> to vector<8x8xf32>
      %105 = arith.subf %96, %104 : vector<8x8xf32>
      %106 = math.exp %105 : vector<8x8xf32>
      %c2_75 = arith.constant 2 : index
      %c0_76 = arith.constant 0 : index
      %c0_77 = arith.constant 0 : index
      %107 = vector.load %arg8[%c2_75, %c0_76, %c0_77] : memref<4x8x1xf32, #tpu.memory_space<vmem>>, vector<1x8x1xf32>
      %108 = vector.shape_cast %107 : vector<1x8x1xf32> to vector<8x1xf32>
      %109 = arith.mulf %103, %108 : vector<8x1xf32>
      %cst_78 = arith.constant dense<0.000000e+00> : vector<8xf32>
      %110 = vector.multi_reduction <add>, %106, %cst_78 [1] : vector<8x8xf32> to vector<8xf32>
      %111 = vector.shape_cast %110 : vector<8xf32> to vector<8x1xf32>
      %112 = arith.addf %109, %111 : vector<8x1xf32>
      %c2_79 = arith.constant 2 : index
      %c0_80 = arith.constant 0 : index
      %c0_81 = arith.constant 0 : index
      %113 = vector.load %arg8[%c2_79, %c0_80, %c0_81] : memref<4x8x1xf32, #tpu.memory_space<vmem>>, vector<1x8x1xf32>
      %114 = vector.shape_cast %113 : vector<1x8x1xf32> to vector<8x1xf32>
      %115 = vector.shape_cast %112 : vector<8x1xf32> to vector<1x8x1xf32>
      tpu.vector_store %arg8[%c2_79, %c0_80, %c0_81], %115 {strides = array<i32>} : memref<4x8x1xf32, #tpu.memory_space<vmem>>, vector<1x8x1xf32>,
      %c2_82 = arith.constant 2 : index
      %c0_83 = arith.constant 0 : index
      %c0_84 = arith.constant 0 : index
      %116 = vector.load %arg9[%c2_82, %c0_83, %c0_84] : memref<4x8x8xf32, #tpu.memory_space<vmem>>, vector<1x8x8xf32>
      %117 = vector.shape_cast %116 : vector<1x8x8xf32> to vector<8x8xf32>
      %118 = vector.broadcast %103 : vector<8x1xf32> to vector<8x8xf32>
      %119 = arith.mulf %118, %117 : vector<8x8xf32>
      %120 = arith.truncf %106 : vector<8x8xf32> to vector<8x8xbf16>
      %cst_85 = arith.constant dense<0.000000e+00> : vector<8x8xf32>
      %121 = tpu.matmul %120, %95, %cst_85 {dimension_numbers = #tpu.dot_dimension_numbers<[1], [0], [0], [1], [0, 0, 1, 1], [], []>} : vector<8x8xbf16>, vector<8x8xbf16>, vector<8x8xf32> -> vector<8x8xf32>
      %122 = arith.addf %119, %121 : vector<8x8xf32>
      %c2_86 = arith.constant 2 : index
      %c0_87 = arith.constant 0 : index
      %c0_88 = arith.constant 0 : index
      %123 = vector.load %arg9[%c2_86, %c0_87, %c0_88] : memref<4x8x8xf32, #tpu.memory_space<vmem>>, vector<1x8x8xf32>
      %124 = vector.shape_cast %123 : vector<1x8x8xf32> to vector<8x8xf32>
      %125 = vector.shape_cast %122 : vector<8x8xf32> to vector<1x8x8xf32>
      tpu.vector_store %arg9[%c2_86, %c0_87, %c0_88], %125 {strides = array<i32>} : memref<4x8x8xf32, #tpu.memory_space<vmem>>, vector<1x8x8xf32>,
      %c2_89 = arith.constant 2 : index
      %c0_90 = arith.constant 0 : index
      %c0_91 = arith.constant 0 : index
      %126 = vector.load %arg7[%c2_89, %c0_90, %c0_91] : memref<4x8x1xf32, #tpu.memory_space<vmem>>, vector<1x8x1xf32>
      %127 = vector.shape_cast %126 : vector<1x8x1xf32> to vector<8x1xf32>
      %128 = vector.shape_cast %101 : vector<8x1xf32> to vector<1x8x1xf32>
      tpu.vector_store %arg7[%c2_89, %c0_90, %c0_91], %128 {strides = array<i32>} : memref<4x8x1xf32, #tpu.memory_space<vmem>>, vector<1x8x1xf32>,
      %c0_92 = arith.constant 0 : index
      %c0_93 = arith.constant 0 : index
      %c24 = arith.constant 24 : index
      %129 = vector.load %arg3[%c0_92, %c0_93, %c24] : memref<1x8x32xbf16, #tpu.memory_space<vmem>>, vector<1x8x8xbf16>
      %130 = vector.shape_cast %129 : vector<1x8x8xbf16> to vector<8x8xbf16>
      %c0_94 = arith.constant 0 : index
      %c0_95 = arith.constant 0 : index
      %c24_96 = arith.constant 24 : index
      %131 = vector.load %arg4[%c0_94, %c0_95, %c24_96] : memref<1x8x32xbf16, #tpu.memory_space<vmem>>, vector<1x8x8xbf16>
      %132 = vector.shape_cast %131 : vector<1x8x8xbf16> to vector<8x8xbf16>
      %c0_97 = arith.constant 0 : index
      %c0_98 = arith.constant 0 : index
      %c24_99 = arith.constant 24 : index
      %133 = vector.load %arg5[%c0_97, %c0_98, %c24_99] : memref<1x8x32xbf16, #tpu.memory_space<vmem>>, vector<1x8x8xbf16>
      %134 = vector.shape_cast %133 : vector<1x8x8xbf16> to vector<8x8xbf16>
      %cst_100 = arith.constant dense<0.000000e+00> : vector<8x8xf32>
      %135 = tpu.matmul %130, %132, %cst_100 {dimension_numbers = #tpu.dot_dimension_numbers<[1], [1], [0], [0], [0, 0, 1, 0], [], []>} : vector<8x8xbf16>, vector<8x8xbf16>, vector<8x8xf32> -> vector<8x8xf32>
      %c3 = arith.constant 3 : index
      %c0_101 = arith.constant 0 : index
      %c0_102 = arith.constant 0 : index
      %136 = vector.load %arg7[%c3, %c0_101, %c0_102] : memref<4x8x1xf32, #tpu.memory_space<vmem>>, vector<1x8x1xf32>
      %137 = vector.shape_cast %136 : vector<1x8x1xf32> to vector<8x1xf32>
      %cst_103 = arith.constant dense<0xFF800000> : vector<8xf32>
      %138 = vector.multi_reduction <maximumf>, %135, %cst_103 [1] : vector<8x8xf32> to vector<8xf32>
      %139 = vector.shape_cast %138 : vector<8xf32> to vector<8x1xf32>
      %140 = arith.maximumf %137, %139 : vector<8x1xf32>
      %141 = arith.subf %137, %140 : vector<8x1xf32>
      %142 = math.exp %141 : vector<8x1xf32>
      %143 = vector.broadcast %140 : vector<8x1xf32> to vector<8x8xf32>
      %144 = arith.subf %135, %143 : vector<8x8xf32>
      %145 = math.exp %144 : vector<8x8xf32>
      %c3_104 = arith.constant 3 : index
      %c0_105 = arith.constant 0 : index
      %c0_106 = arith.constant 0 : index
      %146 = vector.load %arg8[%c3_104, %c0_105, %c0_106] : memref<4x8x1xf32, #tpu.memory_space<vmem>>, vector<1x8x1xf32>
      %147 = vector.shape_cast %146 : vector<1x8x1xf32> to vector<8x1xf32>
      %148 = arith.mulf %142, %147 : vector<8x1xf32>
      %cst_107 = arith.constant dense<0.000000e+00> : vector<8xf32>
      %149 = vector.multi_reduction <add>, %145, %cst_107 [1] : vector<8x8xf32> to vector<8xf32>
      %150 = vector.shape_cast %149 : vector<8xf32> to vector<8x1xf32>
      %151 = arith.addf %148, %150 : vector<8x1xf32>
      %c3_108 = arith.constant 3 : index
      %c0_109 = arith.constant 0 : index
      %c0_110 = arith.constant 0 : index
      %152 = vector.load %arg8[%c3_108, %c0_109, %c0_110] : memref<4x8x1xf32, #tpu.memory_space<vmem>>, vector<1x8x1xf32>
      %153 = vector.shape_cast %152 : vector<1x8x1xf32> to vector<8x1xf32>
      %154 = vector.shape_cast %151 : vector<8x1xf32> to vector<1x8x1xf32>
      tpu.vector_store %arg8[%c3_108, %c0_109, %c0_110], %154 {strides = array<i32>} : memref<4x8x1xf32, #tpu.memory_space<vmem>>, vector<1x8x1xf32>,
      %c3_111 = arith.constant 3 : index
      %c0_112 = arith.constant 0 : index
      %c0_113 = arith.constant 0 : index
      %155 = vector.load %arg9[%c3_111, %c0_112, %c0_113] : memref<4x8x8xf32, #tpu.memory_space<vmem>>, vector<1x8x8xf32>
      %156 = vector.shape_cast %155 : vector<1x8x8xf32> to vector<8x8xf32>
      %157 = vector.broadcast %142 : vector<8x1xf32> to vector<8x8xf32>
      %158 = arith.mulf %157, %156 : vector<8x8xf32>
      %159 = arith.truncf %145 : vector<8x8xf32> to vector<8x8xbf16>
      %cst_114 = arith.constant dense<0.000000e+00> : vector<8x8xf32>
      %160 = tpu.matmul %159, %134, %cst_114 {dimension_numbers = #tpu.dot_dimension_numbers<[1], [0], [0], [1], [0, 0, 1, 1], [], []>} : vector<8x8xbf16>, vector<8x8xbf16>, vector<8x8xf32> -> vector<8x8xf32>
      %161 = arith.addf %158, %160 : vector<8x8xf32>
      %c3_115 = arith.constant 3 : index
      %c0_116 = arith.constant 0 : index
      %c0_117 = arith.constant 0 : index
      %162 = vector.load %arg9[%c3_115, %c0_116, %c0_117] : memref<4x8x8xf32, #tpu.memory_space<vmem>>, vector<1x8x8xf32>
      %163 = vector.shape_cast %162 : vector<1x8x8xf32> to vector<8x8xf32>
      %164 = vector.shape_cast %161 : vector<8x8xf32> to vector<1x8x8xf32>
      tpu.vector_store %arg9[%c3_115, %c0_116, %c0_117], %164 {strides = array<i32>} : memref<4x8x8xf32, #tpu.memory_space<vmem>>, vector<1x8x8xf32>,
      %c3_118 = arith.constant 3 : index
      %c0_119 = arith.constant 0 : index
      %c0_120 = arith.constant 0 : index
      %165 = vector.load %arg7[%c3_118, %c0_119, %c0_120] : memref<4x8x1xf32, #tpu.memory_space<vmem>>, vector<1x8x1xf32>
      %166 = vector.shape_cast %165 : vector<1x8x1xf32> to vector<8x1xf32>
      %167 = vector.shape_cast %140 : vector<8x1xf32> to vector<1x8x1xf32>
      tpu.vector_store %arg7[%c3_118, %c0_119, %c0_120], %167 {strides = array<i32>} : memref<4x8x1xf32, #tpu.memory_space<vmem>>, vector<1x8x1xf32>,
    } else {
    }
    %6 = arith.cmpi eq, %arg2, %arg1 : i32
    %7 = arith.extui %6 : i1 to i32
    %c0_i32_2 = arith.constant 0 : i32
    %8 = arith.cmpi ne, %7, %c0_i32_2 : i32
    scf.if %8 {
      %c8_i32 = arith.constant 8 : i32
      %12 = arith.muli %arg1, %c8_i32 : i32
      %13 = tpu.iota {dimensions = array<i32: 0>} : vector<8x8xi32>
      %14 = vector.broadcast %12 : i32 to vector<8x8xi32>
      %15 = arith.addi %14, %13 : vector<8x8xi32>
      %c8_i32_5 = arith.constant 8 : i32
      %16 = arith.muli %arg2, %c8_i32_5 : i32
      %17 = tpu.iota {dimensions = array<i32: 1>} : vector<8x8xi32>
      %18 = vector.broadcast %16 : i32 to vector<8x8xi32>
      %19 = arith.addi %18, %17 : vector<8x8xi32>
      %20 = arith.cmpi sle, %19, %15 : vector<8x8xi32>
      %c0 = arith.constant 0 : index
      %c0_6 = arith.constant 0 : index
      %c0_7 = arith.constant 0 : index
      %21 = vector.load %arg3[%c0, %c0_6, %c0_7] : memref<1x8x32xbf16, #tpu.memory_space<vmem>>, vector<1x8x8xbf16>
      %22 = vector.shape_cast %21 : vector<1x8x8xbf16> to vector<8x8xbf16>
      %c0_8 = arith.constant 0 : index
      %c0_9 = arith.constant 0 : index
      %c0_10 = arith.constant 0 : index
      %23 = vector.load %arg4[%c0_8, %c0_9, %c0_10] : memref<1x8x32xbf16, #tpu.memory_space<vmem>>, vector<1x8x8xbf16>
      %24 = vector.shape_cast %23 : vector<1x8x8xbf16> to vector<8x8xbf16>
      %c0_11 = arith.constant 0 : index
      %c0_12 = arith.constant 0 : index
      %c0_13 = arith.constant 0 : index
      %25 = vector.load %arg5[%c0_11, %c0_12, %c0_13] : memref<1x8x32xbf16, #tpu.memory_space<vmem>>, vector<1x8x8xbf16>
      %26 = vector.shape_cast %25 : vector<1x8x8xbf16> to vector<8x8xbf16>
      %cst = arith.constant dense<0.000000e+00> : vector<8x8xf32>
      %27 = tpu.matmul %22, %24, %cst {dimension_numbers = #tpu.dot_dimension_numbers<[1], [1], [0], [0], [0, 0, 1, 0], [], []>} : vector<8x8xbf16>, vector<8x8xbf16>, vector<8x8xf32> -> vector<8x8xf32>
      %cst_14 = arith.constant -1.000000e+30 : f32
      %28 = vector.broadcast %cst_14 : f32 to vector<8x8xf32>
      %29 = arith.select %20, %27, %28 : vector<8x8xi1>, vector<8x8xf32>
      %c0_15 = arith.constant 0 : index
      %c0_16 = arith.constant 0 : index
      %c0_17 = arith.constant 0 : index
      %30 = vector.load %arg7[%c0_15, %c0_16, %c0_17] : memref<4x8x1xf32, #tpu.memory_space<vmem>>, vector<1x8x1xf32>
      %31 = vector.shape_cast %30 : vector<1x8x1xf32> to vector<8x1xf32>
      %cst_18 = arith.constant dense<0xFF800000> : vector<8xf32>
      %32 = vector.multi_reduction <maximumf>, %29, %cst_18 [1] : vector<8x8xf32> to vector<8xf32>
      %33 = vector.shape_cast %32 : vector<8xf32> to vector<8x1xf32>
      %34 = arith.maximumf %31, %33 : vector<8x1xf32>
      %35 = arith.subf %31, %34 : vector<8x1xf32>
      %36 = math.exp %35 : vector<8x1xf32>
      %37 = vector.broadcast %34 : vector<8x1xf32> to vector<8x8xf32>
      %38 = arith.subf %29, %37 : vector<8x8xf32>
      %39 = math.exp %38 : vector<8x8xf32>
      %c0_19 = arith.constant 0 : index
      %c0_20 = arith.constant 0 : index
      %c0_21 = arith.constant 0 : index
      %40 = vector.load %arg8[%c0_19, %c0_20, %c0_21] : memref<4x8x1xf32, #tpu.memory_space<vmem>>, vector<1x8x1xf32>
      %41 = vector.shape_cast %40 : vector<1x8x1xf32> to vector<8x1xf32>
      %42 = arith.mulf %36, %41 : vector<8x1xf32>
      %cst_22 = arith.constant dense<0.000000e+00> : vector<8xf32>
      %43 = vector.multi_reduction <add>, %39, %cst_22 [1] : vector<8x8xf32> to vector<8xf32>
      %44 = vector.shape_cast %43 : vector<8xf32> to vector<8x1xf32>
      %45 = arith.addf %42, %44 : vector<8x1xf32>
      %c0_23 = arith.constant 0 : index
      %c0_24 = arith.constant 0 : index
      %c0_25 = arith.constant 0 : index
      %46 = vector.load %arg8[%c0_23, %c0_24, %c0_25] : memref<4x8x1xf32, #tpu.memory_space<vmem>>, vector<1x8x1xf32>
      %47 = vector.shape_cast %46 : vector<1x8x1xf32> to vector<8x1xf32>
      %48 = vector.shape_cast %45 : vector<8x1xf32> to vector<1x8x1xf32>
      tpu.vector_store %arg8[%c0_23, %c0_24, %c0_25], %48 {strides = array<i32>} : memref<4x8x1xf32, #tpu.memory_space<vmem>>, vector<1x8x1xf32>,
      %c0_26 = arith.constant 0 : index
      %c0_27 = arith.constant 0 : index
      %c0_28 = arith.constant 0 : index
      %49 = vector.load %arg9[%c0_26, %c0_27, %c0_28] : memref<4x8x8xf32, #tpu.memory_space<vmem>>, vector<1x8x8xf32>
      %50 = vector.shape_cast %49 : vector<1x8x8xf32> to vector<8x8xf32>
      %51 = vector.broadcast %36 : vector<8x1xf32> to vector<8x8xf32>
      %52 = arith.mulf %51, %50 : vector<8x8xf32>
      %53 = arith.truncf %39 : vector<8x8xf32> to vector<8x8xbf16>
      %cst_29 = arith.constant dense<0.000000e+00> : vector<8x8xf32>
      %54 = tpu.matmul %53, %26, %cst_29 {dimension_numbers = #tpu.dot_dimension_numbers<[1], [0], [0], [1], [0, 0, 1, 1], [], []>} : vector<8x8xbf16>, vector<8x8xbf16>, vector<8x8xf32> -> vector<8x8xf32>
      %55 = arith.addf %52, %54 : vector<8x8xf32>
      %c0_30 = arith.constant 0 : index
      %c0_31 = arith.constant 0 : index
      %c0_32 = arith.constant 0 : index
      %56 = vector.load %arg9[%c0_30, %c0_31, %c0_32] : memref<4x8x8xf32, #tpu.memory_space<vmem>>, vector<1x8x8xf32>
      %57 = vector.shape_cast %56 : vector<1x8x8xf32> to vector<8x8xf32>
      %58 = vector.shape_cast %55 : vector<8x8xf32> to vector<1x8x8xf32>
      tpu.vector_store %arg9[%c0_30, %c0_31, %c0_32], %58 {strides = array<i32>} : memref<4x8x8xf32, #tpu.memory_space<vmem>>, vector<1x8x8xf32>,
      %c0_33 = arith.constant 0 : index
      %c0_34 = arith.constant 0 : index
      %c0_35 = arith.constant 0 : index
      %59 = vector.load %arg7[%c0_33, %c0_34, %c0_35] : memref<4x8x1xf32, #tpu.memory_space<vmem>>, vector<1x8x1xf32>
      %60 = vector.shape_cast %59 : vector<1x8x1xf32> to vector<8x1xf32>
      %61 = vector.shape_cast %34 : vector<8x1xf32> to vector<1x8x1xf32>
      tpu.vector_store %arg7[%c0_33, %c0_34, %c0_35], %61 {strides = array<i32>} : memref<4x8x1xf32, #tpu.memory_space<vmem>>, vector<1x8x1xf32>,
      %c0_36 = arith.constant 0 : index
      %c0_37 = arith.constant 0 : index
      %c8 = arith.constant 8 : index
      %62 = vector.load %arg3[%c0_36, %c0_37, %c8] : memref<1x8x32xbf16, #tpu.memory_space<vmem>>, vector<1x8x8xbf16>
      %63 = vector.shape_cast %62 : vector<1x8x8xbf16> to vector<8x8xbf16>
      %c0_38 = arith.constant 0 : index
      %c0_39 = arith.constant 0 : index
      %c8_40 = arith.constant 8 : index
      %64 = vector.load %arg4[%c0_38, %c0_39, %c8_40] : memref<1x8x32xbf16, #tpu.memory_space<vmem>>, vector<1x8x8xbf16>
      %65 = vector.shape_cast %64 : vector<1x8x8xbf16> to vector<8x8xbf16>
      %c0_41 = arith.constant 0 : index
      %c0_42 = arith.constant 0 : index
      %c8_43 = arith.constant 8 : index
      %66 = vector.load %arg5[%c0_41, %c0_42, %c8_43] : memref<1x8x32xbf16, #tpu.memory_space<vmem>>, vector<1x8x8xbf16>
      %67 = vector.shape_cast %66 : vector<1x8x8xbf16> to vector<8x8xbf16>
      %cst_44 = arith.constant dense<0.000000e+00> : vector<8x8xf32>
      %68 = tpu.matmul %63, %65, %cst_44 {dimension_numbers = #tpu.dot_dimension_numbers<[1], [1], [0], [0], [0, 0, 1, 0], [], []>} : vector<8x8xbf16>, vector<8x8xbf16>, vector<8x8xf32> -> vector<8x8xf32>
      %cst_45 = arith.constant -1.000000e+30 : f32
      %69 = vector.broadcast %cst_45 : f32 to vector<8x8xf32>
      %70 = arith.select %20, %68, %69 : vector<8x8xi1>, vector<8x8xf32>
      %c1 = arith.constant 1 : index
      %c0_46 = arith.constant 0 : index
      %c0_47 = arith.constant 0 : index
      %71 = vector.load %arg7[%c1, %c0_46, %c0_47] : memref<4x8x1xf32, #tpu.memory_space<vmem>>, vector<1x8x1xf32>
      %72 = vector.shape_cast %71 : vector<1x8x1xf32> to vector<8x1xf32>
      %cst_48 = arith.constant dense<0xFF800000> : vector<8xf32>
      %73 = vector.multi_reduction <maximumf>, %70, %cst_48 [1] : vector<8x8xf32> to vector<8xf32>
      %74 = vector.shape_cast %73 : vector<8xf32> to vector<8x1xf32>
      %75 = arith.maximumf %72, %74 : vector<8x1xf32>
      %76 = arith.subf %72, %75 : vector<8x1xf32>
      %77 = math.exp %76 : vector<8x1xf32>
      %78 = vector.broadcast %75 : vector<8x1xf32> to vector<8x8xf32>
      %79 = arith.subf %70, %78 : vector<8x8xf32>
      %80 = math.exp %79 : vector<8x8xf32>
      %c1_49 = arith.constant 1 : index
      %c0_50 = arith.constant 0 : index
      %c0_51 = arith.constant 0 : index
      %81 = vector.load %arg8[%c1_49, %c0_50, %c0_51] : memref<4x8x1xf32, #tpu.memory_space<vmem>>, vector<1x8x1xf32>
      %82 = vector.shape_cast %81 : vector<1x8x1xf32> to vector<8x1xf32>
      %83 = arith.mulf %77, %82 : vector<8x1xf32>
      %cst_52 = arith.constant dense<0.000000e+00> : vector<8xf32>
      %84 = vector.multi_reduction <add>, %80, %cst_52 [1] : vector<8x8xf32> to vector<8xf32>
      %85 = vector.shape_cast %84 : vector<8xf32> to vector<8x1xf32>
      %86 = arith.addf %83, %85 : vector<8x1xf32>
      %c1_53 = arith.constant 1 : index
      %c0_54 = arith.constant 0 : index
      %c0_55 = arith.constant 0 : index
      %87 = vector.load %arg8[%c1_53, %c0_54, %c0_55] : memref<4x8x1xf32, #tpu.memory_space<vmem>>, vector<1x8x1xf32>
      %88 = vector.shape_cast %87 : vector<1x8x1xf32> to vector<8x1xf32>
      %89 = vector.shape_cast %86 : vector<8x1xf32> to vector<1x8x1xf32>
      tpu.vector_store %arg8[%c1_53, %c0_54, %c0_55], %89 {strides = array<i32>} : memref<4x8x1xf32, #tpu.memory_space<vmem>>, vector<1x8x1xf32>,
      %c1_56 = arith.constant 1 : index
      %c0_57 = arith.constant 0 : index
      %c0_58 = arith.constant 0 : index
      %90 = vector.load %arg9[%c1_56, %c0_57, %c0_58] : memref<4x8x8xf32, #tpu.memory_space<vmem>>, vector<1x8x8xf32>
      %91 = vector.shape_cast %90 : vector<1x8x8xf32> to vector<8x8xf32>
      %92 = vector.broadcast %77 : vector<8x1xf32> to vector<8x8xf32>
      %93 = arith.mulf %92, %91 : vector<8x8xf32>
      %94 = arith.truncf %80 : vector<8x8xf32> to vector<8x8xbf16>
      %cst_59 = arith.constant dense<0.000000e+00> : vector<8x8xf32>
      %95 = tpu.matmul %94, %67, %cst_59 {dimension_numbers = #tpu.dot_dimension_numbers<[1], [0], [0], [1], [0, 0, 1, 1], [], []>} : vector<8x8xbf16>, vector<8x8xbf16>, vector<8x8xf32> -> vector<8x8xf32>
      %96 = arith.addf %93, %95 : vector<8x8xf32>
      %c1_60 = arith.constant 1 : index
      %c0_61 = arith.constant 0 : index
      %c0_62 = arith.constant 0 : index
      %97 = vector.load %arg9[%c1_60, %c0_61, %c0_62] : memref<4x8x8xf32, #tpu.memory_space<vmem>>, vector<1x8x8xf32>
      %98 = vector.shape_cast %97 : vector<1x8x8xf32> to vector<8x8xf32>
      %99 = vector.shape_cast %96 : vector<8x8xf32> to vector<1x8x8xf32>
      tpu.vector_store %arg9[%c1_60, %c0_61, %c0_62], %99 {strides = array<i32>} : memref<4x8x8xf32, #tpu.memory_space<vmem>>, vector<1x8x8xf32>,
      %c1_63 = arith.constant 1 : index
      %c0_64 = arith.constant 0 : index
      %c0_65 = arith.constant 0 : index
      %100 = vector.load %arg7[%c1_63, %c0_64, %c0_65] : memref<4x8x1xf32, #tpu.memory_space<vmem>>, vector<1x8x1xf32>
      %101 = vector.shape_cast %100 : vector<1x8x1xf32> to vector<8x1xf32>
      %102 = vector.shape_cast %75 : vector<8x1xf32> to vector<1x8x1xf32>
      tpu.vector_store %arg7[%c1_63, %c0_64, %c0_65], %102 {strides = array<i32>} : memref<4x8x1xf32, #tpu.memory_space<vmem>>, vector<1x8x1xf32>,
      %c0_66 = arith.constant 0 : index
      %c0_67 = arith.constant 0 : index
      %c16 = arith.constant 16 : index
      %103 = vector.load %arg3[%c0_66, %c0_67, %c16] : memref<1x8x32xbf16, #tpu.memory_space<vmem>>, vector<1x8x8xbf16>
      %104 = vector.shape_cast %103 : vector<1x8x8xbf16> to vector<8x8xbf16>
      %c0_68 = arith.constant 0 : index
      %c0_69 = arith.constant 0 : index
      %c16_70 = arith.constant 16 : index
      %105 = vector.load %arg4[%c0_68, %c0_69, %c16_70] : memref<1x8x32xbf16, #tpu.memory_space<vmem>>, vector<1x8x8xbf16>
      %106 = vector.shape_cast %105 : vector<1x8x8xbf16> to vector<8x8xbf16>
      %c0_71 = arith.constant 0 : index
      %c0_72 = arith.constant 0 : index
      %c16_73 = arith.constant 16 : index
      %107 = vector.load %arg5[%c0_71, %c0_72, %c16_73] : memref<1x8x32xbf16, #tpu.memory_space<vmem>>, vector<1x8x8xbf16>
      %108 = vector.shape_cast %107 : vector<1x8x8xbf16> to vector<8x8xbf16>
      %cst_74 = arith.constant dense<0.000000e+00> : vector<8x8xf32>
      %109 = tpu.matmul %104, %106, %cst_74 {dimension_numbers = #tpu.dot_dimension_numbers<[1], [1], [0], [0], [0, 0, 1, 0], [], []>} : vector<8x8xbf16>, vector<8x8xbf16>, vector<8x8xf32> -> vector<8x8xf32>
      %cst_75 = arith.constant -1.000000e+30 : f32
      %110 = vector.broadcast %cst_75 : f32 to vector<8x8xf32>
      %111 = arith.select %20, %109, %110 : vector<8x8xi1>, vector<8x8xf32>
      %c2 = arith.constant 2 : index
      %c0_76 = arith.constant 0 : index
      %c0_77 = arith.constant 0 : index
      %112 = vector.load %arg7[%c2, %c0_76, %c0_77] : memref<4x8x1xf32, #tpu.memory_space<vmem>>, vector<1x8x1xf32>
      %113 = vector.shape_cast %112 : vector<1x8x1xf32> to vector<8x1xf32>
      %cst_78 = arith.constant dense<0xFF800000> : vector<8xf32>
      %114 = vector.multi_reduction <maximumf>, %111, %cst_78 [1] : vector<8x8xf32> to vector<8xf32>
      %115 = vector.shape_cast %114 : vector<8xf32> to vector<8x1xf32>
      %116 = arith.maximumf %113, %115 : vector<8x1xf32>
      %117 = arith.subf %113, %116 : vector<8x1xf32>
      %118 = math.exp %117 : vector<8x1xf32>
      %119 = vector.broadcast %116 : vector<8x1xf32> to vector<8x8xf32>
      %120 = arith.subf %111, %119 : vector<8x8xf32>
      %121 = math.exp %120 : vector<8x8xf32>
      %c2_79 = arith.constant 2 : index
      %c0_80 = arith.constant 0 : index
      %c0_81 = arith.constant 0 : index
      %122 = vector.load %arg8[%c2_79, %c0_80, %c0_81] : memref<4x8x1xf32, #tpu.memory_space<vmem>>, vector<1x8x1xf32>
      %123 = vector.shape_cast %122 : vector<1x8x1xf32> to vector<8x1xf32>
      %124 = arith.mulf %118, %123 : vector<8x1xf32>
      %cst_82 = arith.constant dense<0.000000e+00> : vector<8xf32>
      %125 = vector.multi_reduction <add>, %121, %cst_82 [1] : vector<8x8xf32> to vector<8xf32>
      %126 = vector.shape_cast %125 : vector<8xf32> to vector<8x1xf32>
      %127 = arith.addf %124, %126 : vector<8x1xf32>
      %c2_83 = arith.constant 2 : index
      %c0_84 = arith.constant 0 : index
      %c0_85 = arith.constant 0 : index
      %128 = vector.load %arg8[%c2_83, %c0_84, %c0_85] : memref<4x8x1xf32, #tpu.memory_space<vmem>>, vector<1x8x1xf32>
      %129 = vector.shape_cast %128 : vector<1x8x1xf32> to vector<8x1xf32>
      %130 = vector.shape_cast %127 : vector<8x1xf32> to vector<1x8x1xf32>
      tpu.vector_store %arg8[%c2_83, %c0_84, %c0_85], %130 {strides = array<i32>} : memref<4x8x1xf32, #tpu.memory_space<vmem>>, vector<1x8x1xf32>,
      %c2_86 = arith.constant 2 : index
      %c0_87 = arith.constant 0 : index
      %c0_88 = arith.constant 0 : index
      %131 = vector.load %arg9[%c2_86, %c0_87, %c0_88] : memref<4x8x8xf32, #tpu.memory_space<vmem>>, vector<1x8x8xf32>
      %132 = vector.shape_cast %131 : vector<1x8x8xf32> to vector<8x8xf32>
      %133 = vector.broadcast %118 : vector<8x1xf32> to vector<8x8xf32>
      %134 = arith.mulf %133, %132 : vector<8x8xf32>
      %135 = arith.truncf %121 : vector<8x8xf32> to vector<8x8xbf16>
      %cst_89 = arith.constant dense<0.000000e+00> : vector<8x8xf32>
      %136 = tpu.matmul %135, %108, %cst_89 {dimension_numbers = #tpu.dot_dimension_numbers<[1], [0], [0], [1], [0, 0, 1, 1], [], []>} : vector<8x8xbf16>, vector<8x8xbf16>, vector<8x8xf32> -> vector<8x8xf32>
      %137 = arith.addf %134, %136 : vector<8x8xf32>
      %c2_90 = arith.constant 2 : index
      %c0_91 = arith.constant 0 : index
      %c0_92 = arith.constant 0 : index
      %138 = vector.load %arg9[%c2_90, %c0_91, %c0_92] : memref<4x8x8xf32, #tpu.memory_space<vmem>>, vector<1x8x8xf32>
      %139 = vector.shape_cast %138 : vector<1x8x8xf32> to vector<8x8xf32>
      %140 = vector.shape_cast %137 : vector<8x8xf32> to vector<1x8x8xf32>
      tpu.vector_store %arg9[%c2_90, %c0_91, %c0_92], %140 {strides = array<i32>} : memref<4x8x8xf32, #tpu.memory_space<vmem>>, vector<1x8x8xf32>,
      %c2_93 = arith.constant 2 : index
      %c0_94 = arith.constant 0 : index
      %c0_95 = arith.constant 0 : index
      %141 = vector.load %arg7[%c2_93, %c0_94, %c0_95] : memref<4x8x1xf32, #tpu.memory_space<vmem>>, vector<1x8x1xf32>
      %142 = vector.shape_cast %141 : vector<1x8x1xf32> to vector<8x1xf32>
      %143 = vector.shape_cast %116 : vector<8x1xf32> to vector<1x8x1xf32>
      tpu.vector_store %arg7[%c2_93, %c0_94, %c0_95], %143 {strides = array<i32>} : memref<4x8x1xf32, #tpu.memory_space<vmem>>, vector<1x8x1xf32>,
      %c0_96 = arith.constant 0 : index
      %c0_97 = arith.constant 0 : index
      %c24 = arith.constant 24 : index
      %144 = vector.load %arg3[%c0_96, %c0_97, %c24] : memref<1x8x32xbf16, #tpu.memory_space<vmem>>, vector<1x8x8xbf16>
      %145 = vector.shape_cast %144 : vector<1x8x8xbf16> to vector<8x8xbf16>
      %c0_98 = arith.constant 0 : index
      %c0_99 = arith.constant 0 : index
      %c24_100 = arith.constant 24 : index
      %146 = vector.load %arg4[%c0_98, %c0_99, %c24_100] : memref<1x8x32xbf16, #tpu.memory_space<vmem>>, vector<1x8x8xbf16>
      %147 = vector.shape_cast %146 : vector<1x8x8xbf16> to vector<8x8xbf16>
      %c0_101 = arith.constant 0 : index
      %c0_102 = arith.constant 0 : index
      %c24_103 = arith.constant 24 : index
      %148 = vector.load %arg5[%c0_101, %c0_102, %c24_103] : memref<1x8x32xbf16, #tpu.memory_space<vmem>>, vector<1x8x8xbf16>
      %149 = vector.shape_cast %148 : vector<1x8x8xbf16> to vector<8x8xbf16>
      %cst_104 = arith.constant dense<0.000000e+00> : vector<8x8xf32>
      %150 = tpu.matmul %145, %147, %cst_104 {dimension_numbers = #tpu.dot_dimension_numbers<[1], [1], [0], [0], [0, 0, 1, 0], [], []>} : vector<8x8xbf16>, vector<8x8xbf16>, vector<8x8xf32> -> vector<8x8xf32>
      %cst_105 = arith.constant -1.000000e+30 : f32
      %151 = vector.broadcast %cst_105 : f32 to vector<8x8xf32>
      %152 = arith.select %20, %150, %151 : vector<8x8xi1>, vector<8x8xf32>
      %c3 = arith.constant 3 : index
      %c0_106 = arith.constant 0 : index
      %c0_107 = arith.constant 0 : index
      %153 = vector.load %arg7[%c3, %c0_106, %c0_107] : memref<4x8x1xf32, #tpu.memory_space<vmem>>, vector<1x8x1xf32>
      %154 = vector.shape_cast %153 : vector<1x8x1xf32> to vector<8x1xf32>
      %cst_108 = arith.constant dense<0xFF800000> : vector<8xf32>
      %155 = vector.multi_reduction <maximumf>, %152, %cst_108 [1] : vector<8x8xf32> to vector<8xf32>
      %156 = vector.shape_cast %155 : vector<8xf32> to vector<8x1xf32>
      %157 = arith.maximumf %154, %156 : vector<8x1xf32>
      %158 = arith.subf %154, %157 : vector<8x1xf32>
      %159 = math.exp %158 : vector<8x1xf32>
      %160 = vector.broadcast %157 : vector<8x1xf32> to vector<8x8xf32>
      %161 = arith.subf %152, %160 : vector<8x8xf32>
      %162 = math.exp %161 : vector<8x8xf32>
      %c3_109 = arith.constant 3 : index
      %c0_110 = arith.constant 0 : index
      %c0_111 = arith.constant 0 : index
      %163 = vector.load %arg8[%c3_109, %c0_110, %c0_111] : memref<4x8x1xf32, #tpu.memory_space<vmem>>, vector<1x8x1xf32>
      %164 = vector.shape_cast %163 : vector<1x8x1xf32> to vector<8x1xf32>
      %165 = arith.mulf %159, %164 : vector<8x1xf32>
      %cst_112 = arith.constant dense<0.000000e+00> : vector<8xf32>
      %166 = vector.multi_reduction <add>, %162, %cst_112 [1] : vector<8x8xf32> to vector<8xf32>
      %167 = vector.shape_cast %166 : vector<8xf32> to vector<8x1xf32>
      %168 = arith.addf %165, %167 : vector<8x1xf32>
      %c3_113 = arith.constant 3 : index
      %c0_114 = arith.constant 0 : index
      %c0_115 = arith.constant 0 : index
      %169 = vector.load %arg8[%c3_113, %c0_114, %c0_115] : memref<4x8x1xf32, #tpu.memory_space<vmem>>, vector<1x8x1xf32>
      %170 = vector.shape_cast %169 : vector<1x8x1xf32> to vector<8x1xf32>
      %171 = vector.shape_cast %168 : vector<8x1xf32> to vector<1x8x1xf32>
      tpu.vector_store %arg8[%c3_113, %c0_114, %c0_115], %171 {strides = array<i32>} : memref<4x8x1xf32, #tpu.memory_space<vmem>>, vector<1x8x1xf32>,
      %c3_116 = arith.constant 3 : index
      %c0_117 = arith.constant 0 : index
      %c0_118 = arith.constant 0 : index
      %172 = vector.load %arg9[%c3_116, %c0_117, %c0_118] : memref<4x8x8xf32, #tpu.memory_space<vmem>>, vector<1x8x8xf32>
      %173 = vector.shape_cast %172 : vector<1x8x8xf32> to vector<8x8xf32>
      %174 = vector.broadcast %159 : vector<8x1xf32> to vector<8x8xf32>
      %175 = arith.mulf %174, %173 : vector<8x8xf32>
      %176 = arith.truncf %162 : vector<8x8xf32> to vector<8x8xbf16>
      %cst_119 = arith.constant dense<0.000000e+00> : vector<8x8xf32>
      %177 = tpu.matmul %176, %149, %cst_119 {dimension_numbers = #tpu.dot_dimension_numbers<[1], [0], [0], [1], [0, 0, 1, 1], [], []>} : vector<8x8xbf16>, vector<8x8xbf16>, vector<8x8xf32> -> vector<8x8xf32>
      %178 = arith.addf %175, %177 : vector<8x8xf32>
      %c3_120 = arith.constant 3 : index
      %c0_121 = arith.constant 0 : index
      %c0_122 = arith.constant 0 : index
      %179 = vector.load %arg9[%c3_120, %c0_121, %c0_122] : memref<4x8x8xf32, #tpu.memory_space<vmem>>, vector<1x8x8xf32>
      %180 = vector.shape_cast %179 : vector<1x8x8xf32> to vector<8x8xf32>
      %181 = vector.shape_cast %178 : vector<8x8xf32> to vector<1x8x8xf32>
      tpu.vector_store %arg9[%c3_120, %c0_121, %c0_122], %181 {strides = array<i32>} : memref<4x8x8xf32, #tpu.memory_space<vmem>>, vector<1x8x8xf32>,
      %c3_123 = arith.constant 3 : index
      %c0_124 = arith.constant 0 : index
      %c0_125 = arith.constant 0 : index
      %182 = vector.load %arg7[%c3_123, %c0_124, %c0_125] : memref<4x8x1xf32, #tpu.memory_space<vmem>>, vector<1x8x1xf32>
      %183 = vector.shape_cast %182 : vector<1x8x1xf32> to vector<8x1xf32>
      %184 = vector.shape_cast %157 : vector<8x1xf32> to vector<1x8x1xf32>
      tpu.vector_store %arg7[%c3_123, %c0_124, %c0_125], %184 {strides = array<i32>} : memref<4x8x1xf32, #tpu.memory_space<vmem>>, vector<1x8x1xf32>,
    } else {
    }
    %c0_i32_3 = arith.constant 0 : i32
    %9 = arith.cmpi eq, %arg2, %c0_i32_3 : i32
    %10 = arith.extui %9 : i1 to i32
    %c0_i32_4 = arith.constant 0 : i32
    %11 = arith.cmpi ne, %10, %c0_i32_4 : i32
    scf.if %11 {
      %c0 = arith.constant 0 : index
      %c0_5 = arith.constant 0 : index
      %c0_6 = arith.constant 0 : index
      %12 = vector.load %arg8[%c0, %c0_5, %c0_6] : memref<4x8x1xf32, #tpu.memory_space<vmem>>, vector<1x8x1xf32>
      %13 = vector.shape_cast %12 : vector<1x8x1xf32> to vector<8x1xf32>
      %cst = arith.constant 9.99999968E-21 : f32
      %14 = vector.broadcast %cst : f32 to vector<8x1xf32>
      %15 = arith.maximumf %13, %14 : vector<8x1xf32>
      %16 = tpu.reciprocal %15 {approx = true} : vector<8x1xf32> -> vector<8x1xf32>
      %c0_7 = arith.constant 0 : index
      %c0_8 = arith.constant 0 : index
      %c0_9 = arith.constant 0 : index
      %17 = vector.load %arg9[%c0_7, %c0_8, %c0_9] : memref<4x8x8xf32, #tpu.memory_space<vmem>>, vector<1x8x8xf32>
      %18 = vector.shape_cast %17 : vector<1x8x8xf32> to vector<8x8xf32>
      %19 = vector.broadcast %16 : vector<8x1xf32> to vector<8x8xf32>
      %20 = arith.mulf %18, %19 : vector<8x8xf32>
      %c1 = arith.constant 1 : index
      %c0_10 = arith.constant 0 : index
      %c0_11 = arith.constant 0 : index
      %21 = vector.load %arg8[%c1, %c0_10, %c0_11] : memref<4x8x1xf32, #tpu.memory_space<vmem>>, vector<1x8x1xf32>
      %22 = vector.shape_cast %21 : vector<1x8x1xf32> to vector<8x1xf32>
      %cst_12 = arith.constant 9.99999968E-21 : f32
      %23 = vector.broadcast %cst_12 : f32 to vector<8x1xf32>
      %24 = arith.maximumf %22, %23 : vector<8x1xf32>
      %25 = tpu.reciprocal %24 {approx = true} : vector<8x1xf32> -> vector<8x1xf32>
      %c1_13 = arith.constant 1 : index
      %c0_14 = arith.constant 0 : index
      %c0_15 = arith.constant 0 : index
      %26 = vector.load %arg9[%c1_13, %c0_14, %c0_15] : memref<4x8x8xf32, #tpu.memory_space<vmem>>, vector<1x8x8xf32>
      %27 = vector.shape_cast %26 : vector<1x8x8xf32> to vector<8x8xf32>
      %28 = vector.broadcast %25 : vector<8x1xf32> to vector<8x8xf32>
      %29 = arith.mulf %27, %28 : vector<8x8xf32>
      %c2 = arith.constant 2 : index
      %c0_16 = arith.constant 0 : index
      %c0_17 = arith.constant 0 : index
      %30 = vector.load %arg8[%c2, %c0_16, %c0_17] : memref<4x8x1xf32, #tpu.memory_space<vmem>>, vector<1x8x1xf32>
      %31 = vector.shape_cast %30 : vector<1x8x1xf32> to vector<8x1xf32>
      %cst_18 = arith.constant 9.99999968E-21 : f32
      %32 = vector.broadcast %cst_18 : f32 to vector<8x1xf32>
      %33 = arith.maximumf %31, %32 : vector<8x1xf32>
      %34 = tpu.reciprocal %33 {approx = true} : vector<8x1xf32> -> vector<8x1xf32>
      %c2_19 = arith.constant 2 : index
      %c0_20 = arith.constant 0 : index
      %c0_21 = arith.constant 0 : index
      %35 = vector.load %arg9[%c2_19, %c0_20, %c0_21] : memref<4x8x8xf32, #tpu.memory_space<vmem>>, vector<1x8x8xf32>
      %36 = vector.shape_cast %35 : vector<1x8x8xf32> to vector<8x8xf32>
      %37 = vector.broadcast %34 : vector<8x1xf32> to vector<8x8xf32>
      %38 = arith.mulf %36, %37 : vector<8x8xf32>
      %c3 = arith.constant 3 : index
      %c0_22 = arith.constant 0 : index
      %c0_23 = arith.constant 0 : index
      %39 = vector.load %arg8[%c3, %c0_22, %c0_23] : memref<4x8x1xf32, #tpu.memory_space<vmem>>, vector<1x8x1xf32>
      %40 = vector.shape_cast %39 : vector<1x8x1xf32> to vector<8x1xf32>
      %cst_24 = arith.constant 9.99999968E-21 : f32
      %41 = vector.broadcast %cst_24 : f32 to vector<8x1xf32>
      %42 = arith.maximumf %40, %41 : vector<8x1xf32>
      %43 = tpu.reciprocal %42 {approx = true} : vector<8x1xf32> -> vector<8x1xf32>
      %c3_25 = arith.constant 3 : index
      %c0_26 = arith.constant 0 : index
      %c0_27 = arith.constant 0 : index
      %44 = vector.load %arg9[%c3_25, %c0_26, %c0_27] : memref<4x8x8xf32, #tpu.memory_space<vmem>>, vector<1x8x8xf32>
      %45 = vector.shape_cast %44 : vector<1x8x8xf32> to vector<8x8xf32>
      %46 = vector.broadcast %43 : vector<8x1xf32> to vector<8x8xf32>
      %47 = arith.mulf %45, %46 : vector<8x8xf32>
      %48 = tpu.concatenate %20, %29, %38, %47 in 1 : vector<8x8xf32>, vector<8x8xf32>, vector<8x8xf32>, vector<8x8xf32> -> vector<8x32xf32>
      %49 = arith.truncf %48 : vector<8x32xf32> to vector<8x32xbf16>
      %c0_28 = arith.constant 0 : index
      %c0_29 = arith.constant 0 : index
      %c0_30 = arith.constant 0 : index
      %50 = vector.load %arg6[%c0_28, %c0_29, %c0_30] : memref<1x8x32xbf16, #tpu.memory_space<vmem>>, vector<1x8x32xbf16>
      %51 = vector.shape_cast %50 : vector<1x8x32xbf16> to vector<8x32xbf16>
      %52 = vector.shape_cast %49 : vector<8x32xbf16> to vector<1x8x32xbf16>
      tpu.vector_store %arg6[%c0_28, %c0_29, %c0_30], %52 {strides = array<i32>} : memref<1x8x32xbf16, #tpu.memory_space<vmem>>, vector<1x8x32xbf16>,
    } else {
    }
    return
  }
  func.func @transform_0(%arg0: i32, %arg1: i32, %arg2: i32) -> (i32, i32, i32) {
    %c0_i32 = arith.constant 0 : i32
    %c0_i32_0 = arith.constant 0 : i32
    return %arg0, %arg1, %c0_i32 : i32, i32, i32
  }
  func.func @transform_1(%arg0: i32, %arg1: i32, %arg2: i32) -> (i32, i32, i32) {
    %0 = arith.minsi %arg2, %arg1 : i32
    %c0_i32 = arith.constant 0 : i32
    %c0_i32_0 = arith.constant 0 : i32
    return %arg0, %0, %c0_i32 : i32, i32, i32
  }
  func.func @transform_2(%arg0: i32, %arg1: i32, %arg2: i32) -> (i32, i32, i32) {
    %0 = arith.minsi %arg2, %arg1 : i32
    %c0_i32 = arith.constant 0 : i32
    %c0_i32_0 = arith.constant 0 : i32
    return %arg0, %0, %c0_i32 : i32, i32, i32
  }
  func.func @transform_3(%arg0: i32, %arg1: i32, %arg2: i32) -> (i32, i32, i32) {
    %c0_i32 = arith.constant 0 : i32
    %c0_i32_0 = arith.constant 0 : i32
    return %arg0, %arg1, %c0_i32 : i32, i32, i32
  }
}

module attributes {stable_mosaic.version = 11 : i64} {
  func.func @_linear_kernel(%arg0: i32, %arg1: i32, %arg2: i32, %arg3: memref<16x32xbf16, #tpu.memory_space<vmem>>, %arg4: memref<32x128xbf16, #tpu.memory_space<vmem>>, %arg5: memref<1x128xf32, #tpu.memory_space<vmem>>, %arg6: memref<16x128xbf16, #tpu.memory_space<vmem>>, %arg7: memref<16x128xf32, #tpu.memory_space<vmem>>) attributes {dimension_semantics = [#tpu.dimension_semantics<parallel>, #tpu.dimension_semantics<parallel>, #tpu.dimension_semantics<arbitrary>], iteration_bounds = array<i64: 1, 1, 1>, scalar_prefetch = 0 : i64, scratch_operands = 1 : i64, tpu.core_type = #tpu.core_type<tc>, window_params = [{transform_indices = @transform_0, window_bounds = array<i64: 16, 32>}, {transform_indices = @transform_1, window_bounds = array<i64: 32, 128>}, {transform_indices = @transform_2, window_bounds = array<i64: 1, 128>}, {transform_indices = @transform_3, window_bounds = array<i64: 16, 128>}]} {
    %c0_i32 = arith.constant 0 : i32
    %0 = arith.cmpi eq, %arg2, %c0_i32 : i32
    %1 = arith.extui %0 : i1 to i32
    %c0_i32_0 = arith.constant 0 : i32
    %2 = arith.cmpi ne, %1, %c0_i32_0 : i32
    scf.if %2 {
      %cst_10 = arith.constant 0.000000e+00 : f32
      %12 = vector.broadcast %cst_10 : f32 to vector<16x128xf32>
      %c0_11 = arith.constant 0 : index
      %c0_12 = arith.constant 0 : index
      %13 = vector.load %arg7[%c0_11, %c0_12] : memref<16x128xf32, #tpu.memory_space<vmem>>, vector<16x128xf32>
      tpu.vector_store %arg7[%c0_11, %c0_12], %12 {strides = array<i32>} : memref<16x128xf32, #tpu.memory_space<vmem>>, vector<16x128xf32>,
    } else {
    }
    %c0 = arith.constant 0 : index
    %c0_1 = arith.constant 0 : index
    %3 = vector.load %arg3[%c0, %c0_1] : memref<16x32xbf16, #tpu.memory_space<vmem>>, vector<16x32xbf16>
    %c0_2 = arith.constant 0 : index
    %c0_3 = arith.constant 0 : index
    %4 = vector.load %arg4[%c0_2, %c0_3] : memref<32x128xbf16, #tpu.memory_space<vmem>>, vector<32x128xbf16>
    %c0_4 = arith.constant 0 : index
    %c0_5 = arith.constant 0 : index
    %5 = vector.load %arg7[%c0_4, %c0_5] : memref<16x128xf32, #tpu.memory_space<vmem>>, vector<16x128xf32>
    %cst = arith.constant dense<0.000000e+00> : vector<16x128xf32>
    %6 = tpu.matmul %3, %4, %cst {dimension_numbers = #tpu.dot_dimension_numbers<[1], [0], [0], [1], [0, 0, 1, 1], [], []>} : vector<16x32xbf16>, vector<32x128xbf16>, vector<16x128xf32> -> vector<16x128xf32>
    %7 = arith.addf %5, %6 : vector<16x128xf32>
    %c0_6 = arith.constant 0 : index
    %c0_7 = arith.constant 0 : index
    %8 = vector.load %arg7[%c0_6, %c0_7] : memref<16x128xf32, #tpu.memory_space<vmem>>, vector<16x128xf32>
    tpu.vector_store %arg7[%c0_6, %c0_7], %7 {strides = array<i32>} : memref<16x128xf32, #tpu.memory_space<vmem>>, vector<16x128xf32>,
    %c0_i32_8 = arith.constant 0 : i32
    %9 = arith.cmpi eq, %arg2, %c0_i32_8 : i32
    %10 = arith.extui %9 : i1 to i32
    %c0_i32_9 = arith.constant 0 : i32
    %11 = arith.cmpi ne, %10, %c0_i32_9 : i32
    scf.if %11 {
      %c0_10 = arith.constant 0 : index
      %c0_11 = arith.constant 0 : index
      %12 = vector.load %arg7[%c0_10, %c0_11] : memref<16x128xf32, #tpu.memory_space<vmem>>, vector<16x128xf32>
      %c0_12 = arith.constant 0 : index
      %c0_13 = arith.constant 0 : index
      %13 = vector.load %arg5[%c0_12, %c0_13] : memref<1x128xf32, #tpu.memory_space<vmem>>, vector<1x128xf32>
      %14 = vector.broadcast %13 : vector<1x128xf32> to vector<16x128xf32>
      %15 = arith.addf %12, %14 : vector<16x128xf32>
      %cst_14 = arith.constant 5.000000e-01 : f32
      %16 = vector.broadcast %cst_14 : f32 to vector<16x128xf32>
      %17 = arith.mulf %16, %15 : vector<16x128xf32>
      %cst_15 = arith.constant 4.471500e-02 : f32
      %18 = vector.broadcast %cst_15 : f32 to vector<16x128xf32>
      %19 = arith.mulf %18, %15 : vector<16x128xf32>
      %20 = arith.mulf %19, %15 : vector<16x128xf32>
      %21 = arith.mulf %20, %15 : vector<16x128xf32>
      %22 = arith.addf %15, %21 : vector<16x128xf32>
      %cst_16 = arith.constant 0.797884583 : f32
      %23 = vector.broadcast %cst_16 : f32 to vector<16x128xf32>
      %24 = arith.mulf %23, %22 : vector<16x128xf32>
      %25 = math.tanh %24 : vector<16x128xf32>
      %cst_17 = arith.constant 1.000000e+00 : f32
      %26 = vector.broadcast %cst_17 : f32 to vector<16x128xf32>
      %27 = arith.addf %26, %25 : vector<16x128xf32>
      %28 = arith.mulf %17, %27 : vector<16x128xf32>
      %29 = arith.truncf %28 : vector<16x128xf32> to vector<16x128xbf16>
      %c0_18 = arith.constant 0 : index
      %c0_19 = arith.constant 0 : index
      %30 = vector.load %arg6[%c0_18, %c0_19] : memref<16x128xbf16, #tpu.memory_space<vmem>>, vector<16x128xbf16>
      tpu.vector_store %arg6[%c0_18, %c0_19], %29 {strides = array<i32>} : memref<16x128xbf16, #tpu.memory_space<vmem>>, vector<16x128xbf16>,
    } else {
    }
    return
  }
  func.func @transform_0(%arg0: i32, %arg1: i32, %arg2: i32) -> (i32, i32) {
    %c0_i32 = arith.constant 0 : i32
    return %arg0, %arg2 : i32, i32
  }
  func.func @transform_1(%arg0: i32, %arg1: i32, %arg2: i32) -> (i32, i32) {
    %c0_i32 = arith.constant 0 : i32
    return %arg2, %arg1 : i32, i32
  }
  func.func @transform_2(%arg0: i32, %arg1: i32, %arg2: i32) -> (i32, i32) {
    %c0_i32 = arith.constant 0 : i32
    %c0_i32_0 = arith.constant 0 : i32
    return %c0_i32, %arg1 : i32, i32
  }
  func.func @transform_3(%arg0: i32, %arg1: i32, %arg2: i32) -> (i32, i32) {
    %c0_i32 = arith.constant 0 : i32
    return %arg0, %arg1 : i32, i32
  }
}

module attributes {stable_mosaic.version = 11 : i64} {
  func.func @_linear_kernel(%arg0: i32, %arg1: i32, %arg2: i32, %arg3: memref<16x128xbf16, #tpu.memory_space<vmem>>, %arg4: memref<128x32xbf16, #tpu.memory_space<vmem>>, %arg5: memref<1x32xf32, #tpu.memory_space<vmem>>, %arg6: memref<16x32xbf16, #tpu.memory_space<vmem>>, %arg7: memref<16x32xbf16, #tpu.memory_space<vmem>>, %arg8: memref<16x32xf32, #tpu.memory_space<vmem>>) attributes {dimension_semantics = [#tpu.dimension_semantics<parallel>, #tpu.dimension_semantics<parallel>, #tpu.dimension_semantics<arbitrary>], iteration_bounds = array<i64: 1, 1, 1>, scalar_prefetch = 0 : i64, scratch_operands = 1 : i64, tpu.core_type = #tpu.core_type<tc>, window_params = [{transform_indices = @transform_0, window_bounds = array<i64: 16, 128>}, {transform_indices = @transform_1, window_bounds = array<i64: 128, 32>}, {transform_indices = @transform_2, window_bounds = array<i64: 1, 32>}, {transform_indices = @transform_3, window_bounds = array<i64: 16, 32>}, {transform_indices = @transform_4, window_bounds = array<i64: 16, 32>}]} {
    %c0_i32 = arith.constant 0 : i32
    %0 = arith.cmpi eq, %arg2, %c0_i32 : i32
    %1 = arith.extui %0 : i1 to i32
    %c0_i32_0 = arith.constant 0 : i32
    %2 = arith.cmpi ne, %1, %c0_i32_0 : i32
    scf.if %2 {
      %cst_10 = arith.constant 0.000000e+00 : f32
      %12 = vector.broadcast %cst_10 : f32 to vector<16x32xf32>
      %c0_11 = arith.constant 0 : index
      %c0_12 = arith.constant 0 : index
      %13 = vector.load %arg8[%c0_11, %c0_12] : memref<16x32xf32, #tpu.memory_space<vmem>>, vector<16x32xf32>
      tpu.vector_store %arg8[%c0_11, %c0_12], %12 {strides = array<i32>} : memref<16x32xf32, #tpu.memory_space<vmem>>, vector<16x32xf32>,
    } else {
    }
    %c0 = arith.constant 0 : index
    %c0_1 = arith.constant 0 : index
    %3 = vector.load %arg3[%c0, %c0_1] : memref<16x128xbf16, #tpu.memory_space<vmem>>, vector<16x128xbf16>
    %c0_2 = arith.constant 0 : index
    %c0_3 = arith.constant 0 : index
    %4 = vector.load %arg4[%c0_2, %c0_3] : memref<128x32xbf16, #tpu.memory_space<vmem>>, vector<128x32xbf16>
    %c0_4 = arith.constant 0 : index
    %c0_5 = arith.constant 0 : index
    %5 = vector.load %arg8[%c0_4, %c0_5] : memref<16x32xf32, #tpu.memory_space<vmem>>, vector<16x32xf32>
    %cst = arith.constant dense<0.000000e+00> : vector<16x32xf32>
    %6 = tpu.matmul %3, %4, %cst {dimension_numbers = #tpu.dot_dimension_numbers<[1], [0], [0], [1], [0, 0, 1, 1], [], []>} : vector<16x128xbf16>, vector<128x32xbf16>, vector<16x32xf32> -> vector<16x32xf32>
    %7 = arith.addf %5, %6 : vector<16x32xf32>
    %c0_6 = arith.constant 0 : index
    %c0_7 = arith.constant 0 : index
    %8 = vector.load %arg8[%c0_6, %c0_7] : memref<16x32xf32, #tpu.memory_space<vmem>>, vector<16x32xf32>
    tpu.vector_store %arg8[%c0_6, %c0_7], %7 {strides = array<i32>} : memref<16x32xf32, #tpu.memory_space<vmem>>, vector<16x32xf32>,
    %c0_i32_8 = arith.constant 0 : i32
    %9 = arith.cmpi eq, %arg2, %c0_i32_8 : i32
    %10 = arith.extui %9 : i1 to i32
    %c0_i32_9 = arith.constant 0 : i32
    %11 = arith.cmpi ne, %10, %c0_i32_9 : i32
    scf.if %11 {
      %c0_10 = arith.constant 0 : index
      %c0_11 = arith.constant 0 : index
      %12 = vector.load %arg8[%c0_10, %c0_11] : memref<16x32xf32, #tpu.memory_space<vmem>>, vector<16x32xf32>
      %c0_12 = arith.constant 0 : index
      %c0_13 = arith.constant 0 : index
      %13 = vector.load %arg5[%c0_12, %c0_13] : memref<1x32xf32, #tpu.memory_space<vmem>>, vector<1x32xf32>
      %14 = vector.broadcast %13 : vector<1x32xf32> to vector<16x32xf32>
      %15 = arith.addf %12, %14 : vector<16x32xf32>
      %c0_14 = arith.constant 0 : index
      %c0_15 = arith.constant 0 : index
      %16 = vector.load %arg6[%c0_14, %c0_15] : memref<16x32xbf16, #tpu.memory_space<vmem>>, vector<16x32xbf16>
      %17 = arith.extf %16 : vector<16x32xbf16> to vector<16x32xf32>
      %18 = arith.addf %15, %17 : vector<16x32xf32>
      %19 = arith.truncf %18 : vector<16x32xf32> to vector<16x32xbf16>
      %c0_16 = arith.constant 0 : index
      %c0_17 = arith.constant 0 : index
      %20 = vector.load %arg7[%c0_16, %c0_17] : memref<16x32xbf16, #tpu.memory_space<vmem>>, vector<16x32xbf16>
      tpu.vector_store %arg7[%c0_16, %c0_17], %19 {strides = array<i32>} : memref<16x32xbf16, #tpu.memory_space<vmem>>, vector<16x32xbf16>,
    } else {
    }
    return
  }
  func.func @transform_0(%arg0: i32, %arg1: i32, %arg2: i32) -> (i32, i32) {
    %c0_i32 = arith.constant 0 : i32
    return %arg0, %arg2 : i32, i32
  }
  func.func @transform_1(%arg0: i32, %arg1: i32, %arg2: i32) -> (i32, i32) {
    %c0_i32 = arith.constant 0 : i32
    return %arg2, %arg1 : i32, i32
  }
  func.func @transform_2(%arg0: i32, %arg1: i32, %arg2: i32) -> (i32, i32) {
    %c0_i32 = arith.constant 0 : i32
    %c0_i32_0 = arith.constant 0 : i32
    return %c0_i32, %arg1 : i32, i32
  }
  func.func @transform_3(%arg0: i32, %arg1: i32, %arg2: i32) -> (i32, i32) {
    %c0_i32 = arith.constant 0 : i32
    return %arg0, %arg1 : i32, i32
  }
  func.func @transform_4(%arg0: i32, %arg1: i32, %arg2: i32) -> (i32, i32) {
    %c0_i32 = arith.constant 0 : i32
    return %arg0, %arg1 : i32, i32
  }
}

module attributes {stable_mosaic.version = 11 : i64} {
  func.func @_linear_kernel(%arg0: i32, %arg1: i32, %arg2: i32, %arg3: memref<16x32xbf16, #tpu.memory_space<vmem>>, %arg4: memref<256x32xbf16, #tpu.memory_space<vmem>>, %arg5: memref<16x256xf32, #tpu.memory_space<vmem>>, %arg6: memref<16x256xf32, #tpu.memory_space<vmem>>) attributes {dimension_semantics = [#tpu.dimension_semantics<parallel>, #tpu.dimension_semantics<parallel>, #tpu.dimension_semantics<arbitrary>], iteration_bounds = array<i64: 1, 1, 1>, scalar_prefetch = 0 : i64, scratch_operands = 1 : i64, tpu.core_type = #tpu.core_type<tc>, window_params = [{transform_indices = @transform_0, window_bounds = array<i64: 16, 32>}, {transform_indices = @transform_1, window_bounds = array<i64: 256, 32>}, {transform_indices = @transform_2, window_bounds = array<i64: 16, 256>}]} {
    %c0_i32 = arith.constant 0 : i32
    %0 = arith.cmpi eq, %arg2, %c0_i32 : i32
    %1 = arith.extui %0 : i1 to i32
    %c0_i32_0 = arith.constant 0 : i32
    %2 = arith.cmpi ne, %1, %c0_i32_0 : i32
    scf.if %2 {
      %cst_10 = arith.constant 0.000000e+00 : f32
      %12 = vector.broadcast %cst_10 : f32 to vector<16x256xf32>
      %c0_11 = arith.constant 0 : index
      %c0_12 = arith.constant 0 : index
      %13 = vector.load %arg6[%c0_11, %c0_12] : memref<16x256xf32, #tpu.memory_space<vmem>>, vector<16x256xf32>
      tpu.vector_store %arg6[%c0_11, %c0_12], %12 {strides = array<i32>} : memref<16x256xf32, #tpu.memory_space<vmem>>, vector<16x256xf32>,
    } else {
    }
    %c0 = arith.constant 0 : index
    %c0_1 = arith.constant 0 : index
    %3 = vector.load %arg3[%c0, %c0_1] : memref<16x32xbf16, #tpu.memory_space<vmem>>, vector<16x32xbf16>
    %c0_2 = arith.constant 0 : index
    %c0_3 = arith.constant 0 : index
    %4 = vector.load %arg4[%c0_2, %c0_3] : memref<256x32xbf16, #tpu.memory_space<vmem>>, vector<256x32xbf16>
    %c0_4 = arith.constant 0 : index
    %c0_5 = arith.constant 0 : index
    %5 = vector.load %arg6[%c0_4, %c0_5] : memref<16x256xf32, #tpu.memory_space<vmem>>, vector<16x256xf32>
    %cst = arith.constant dense<0.000000e+00> : vector<16x256xf32>
    %6 = tpu.matmul %3, %4, %cst {dimension_numbers = #tpu.dot_dimension_numbers<[1], [1], [0], [0], [0, 0, 1, 0], [], []>} : vector<16x32xbf16>, vector<256x32xbf16>, vector<16x256xf32> -> vector<16x256xf32>
    %7 = arith.addf %5, %6 : vector<16x256xf32>
    %c0_6 = arith.constant 0 : index
    %c0_7 = arith.constant 0 : index
    %8 = vector.load %arg6[%c0_6, %c0_7] : memref<16x256xf32, #tpu.memory_space<vmem>>, vector<16x256xf32>
    tpu.vector_store %arg6[%c0_6, %c0_7], %7 {strides = array<i32>} : memref<16x256xf32, #tpu.memory_space<vmem>>, vector<16x256xf32>,
    %c0_i32_8 = arith.constant 0 : i32
    %9 = arith.cmpi eq, %arg2, %c0_i32_8 : i32
    %10 = arith.extui %9 : i1 to i32
    %c0_i32_9 = arith.constant 0 : i32
    %11 = arith.cmpi ne, %10, %c0_i32_9 : i32
    scf.if %11 {
      %c0_10 = arith.constant 0 : index
      %c0_11 = arith.constant 0 : index
      %12 = vector.load %arg6[%c0_10, %c0_11] : memref<16x256xf32, #tpu.memory_space<vmem>>, vector<16x256xf32>
      %c0_12 = arith.constant 0 : index
      %c0_13 = arith.constant 0 : index
      %13 = vector.load %arg5[%c0_12, %c0_13] : memref<16x256xf32, #tpu.memory_space<vmem>>, vector<16x256xf32>
      tpu.vector_store %arg5[%c0_12, %c0_13], %12 {strides = array<i32>} : memref<16x256xf32, #tpu.memory_space<vmem>>, vector<16x256xf32>,
    } else {
    }
    return
  }
  func.func @transform_0(%arg0: i32, %arg1: i32, %arg2: i32) -> (i32, i32) {
    %c0_i32 = arith.constant 0 : i32
    return %arg0, %arg2 : i32, i32
  }
  func.func @transform_1(%arg0: i32, %arg1: i32, %arg2: i32) -> (i32, i32) {
    %c0_i32 = arith.constant 0 : i32
    return %arg1, %arg2 : i32, i32
  }
  func.func @transform_2(%arg0: i32, %arg1: i32, %arg2: i32) -> (i32, i32) {
    %c0_i32 = arith.constant 0 : i32
    return %arg0, %arg1 : i32, i32
  }
}

</mosaic_0001>

<bundles_post_ra>
// kernel: gpt_forward.19
= control target key start
LH: loop header
LB: loop body
LE: loop exit
PB: predicated region body
PF: predicated region fallthrough
CT: control target
= control target key end

     0   :  { %vm22_vm0 = vcmask 261120   ;;  %v163_v0 = vmov 0.0   ;;  %vm164_vm1 = vmmov 0   ;;  %vm127_vm2 = vcmask 257024   ;;  %s216_s1 = inlined_call_operand.vmem [shape: bf16[32,32], index: 1, kind: input, shape index: {}]   ;;  %s217_s0 = inlined_call_operand.vmem [shape: bf16[16,32], index: 0, kind: input, shape index: {}]   ;;  %s218_s3 = inlined_call_operand.vmem [shape: bf16[16,32], index: 3, kind: input, shape index: {}]   ;;  %s219_s2 = inlined_call_operand.vmem [shape: f32[1,32], index: 2, kind: input, shape index: {}]   ;;  %s220_s4 = inlined_call_operand.vmem [shape: bf16[16,32], index: 4, kind: output, shape index: {}]  }
   0x1   :  { %150 = vmatprep.subr.bf16.mxu0 %v163_v0  ;;  %v160_v1 = vld [vmem:[%s216_s1] sm:$0xff]   ;;  %154 = vmatprep.mubr.msk.bf16.mxu0 %vm164_vm1, %v163_v0  ;;  %23 = vst.msk [vmem:[#allocation2] sm:$0xff] %vm22_vm0, %v163_v0  ;;  %24 = vst.msk [vmem:[#allocation2 + $0x8] sm:$0xff] %vm22_vm0, %v163_v0  ;;  %v161_v2 = vld [vmem:[%s216_s1 + $0x8] sm:$0xff]  }
   0x2   :  { %151 = vmatpush3.bf16.msra.mxu0 %v160_v1  ;;  %v162_v3 = vld [vmem:[%s217_s0] sm:$0xff]  }
   0x3   :  { %152 = vmatprep.subr.bf16.mxu0 %v163_v0  ;;  %v144_v12 = vld [vmem:[%s218_s3] sm:$0xff]  }
   0x4   :  { %v138_v13 = vld [vmem:[%s219_s2] ss:$0 sm:$0xff]  ;;  %v145_v14 = vunpack.c.l.bf16 %v144_v12  ;;  %v146_v17 = vunpack.c.h.bf16 %v144_v12 }
   0x6   :  { %153 = vmatpush3.bf16.msra.mxu0 %v161_v2 }
   0x8   :  { %v31_v4 = vld [vmem:[#allocation2] sm:$0xff]  ;;  %v32_v6 = vld [vmem:[#allocation2 + $0x8] sm:$0xff] }
   0x9   :  { %155 = vmatmul.mubr.msk.bf16.vlgmr.msra.gmra.mrb[0].mxu0 %vm22_vm0, %v162_v3 }
  0xdc   :  { %v88_v5 = vpop.f32.mrb[0].mxu0 }
  0xdd   :  { %v95_v7 = vadd.f32 %v88_v5, %v31_v4  ;;  %v156_v8 = vpop.f32.mrb[1].mxu0 }
  0xde   :  { %v91_v9 = vpop.f32.mrb[2].mxu0 }
  0xdf   :  { %97 = vst.msk [vmem:[#allocation2] sm:$0xff] %vm22_vm0, %v95_v7  ;;  %v96_v10 = vadd.f32 %v91_v9, %v32_v6  ;;  %v157_v11 = vpop.f32.mrb[3].mxu0 }
  0xe1   :  { %98 = vst.msk [vmem:[#allocation2 + $0x8] sm:$0xff] %vm22_vm0, %v96_v10 }
  0xe6   :  { %v102_v15 = vld [vmem:[#allocation2] sm:$0xff] }
  0xe7   :  { %v111_v16 = vadd.f32 %v138_v13, %v102_v15 }
  0xe8   :  { %v103_v18 = vld [vmem:[#allocation2 + $0x8] sm:$0xff] }
  0xe9   :  { %v117_v19 = vadd.f32 %v145_v14, %v111_v16  ;;  %v112_v20 = vadd.f32 %v138_v13, %v103_v18 }
  0xeb   :  { %v141_v21 = vpack.c.bf16 %v117_v19, %v117_v19  ;;  %v118_v22 = vadd.f32 %v146_v17, %v112_v20 }
  0xed   :  { %128 = vst.msk [vmem:[%s220_s4] sm:$0xf] %vm127_vm2, %v141_v21  ;;  %v142_v23 = vpack.c.bf16 %v118_v22, %v118_v22 }
  0xef   :  { %129 = vst.msk [vmem:[%s220_s4 + $0x4] sm:$0xf] %vm127_vm2, %v142_v23 }

// kernel: gpt_forward.16
= control target key start
LH: loop header
LB: loop body
LE: loop exit
PB: predicated region body
PF: predicated region fallthrough
CT: control target
= control target key end

     0   :  { %vm18_vm0 = vcmask 261120   ;;  %vm76_vm1 = vcmask 257024   ;;  %s132_s0 = inlined_call_operand.vmem [shape: bf16[16,32], index: 0, kind: input, shape index: {}]   ;;  %s133_s1 = inlined_call_operand.vmem [shape: f32[1,32], index: 1, kind: input, shape index: {}]   ;;  %s134_s2 = inlined_call_operand.vmem [shape: f32[1,32], index: 2, kind: input, shape index: {}]   ;;  %s135_s3 = inlined_call_operand.vmem [shape: bf16[16,32], index: 3, kind: output, shape index: {}]  }
   0x1   :  { %v90_v0 = vld [vmem:[%s132_s0] sm:$0xff]  }
   0x2   :  { %v91_v1 = vunpack.c.l.bf16 %v90_v0  ;;  %v92_v2 = vunpack.c.h.bf16 %v90_v0  ;;  %v83_v25 = vld [vmem:[%s133_s1] ss:$0 sm:$0xff] }
   0x3   :  { %v84_v27 = vld [vmem:[%s134_s2] ss:$0 sm:$0xff] }
   0x4   :  { %v19_v3 = vsel %vm18_vm0, %v91_v1, 0.0  ;;  %v28_v4 = vmul.f32 %v91_v1, %v91_v1  ;;  %v29_v5 = vmul.f32 %v92_v2, %v92_v2  ;;  %v22_v7 = vsel %vm18_vm0, %v92_v2, 0.0 }
   0x5   :  { %20 = vadd.xlane.f32.xlu0 %v19_v3 }
   0x6   :  { %v30_v6 = vsel %vm18_vm0, %v28_v4, 0.0  ;;  %v33_v8 = vsel %vm18_vm0, %v29_v5, 0.0 }
   0x7   :  { %31 = vadd.xlane.f32.xlu1 %v30_v6 }
   0x9   :  { %23 = vadd.xlane.f32.xlu0 %v22_v7 }
   0xb   :  { %34 = vadd.xlane.f32.xlu1 %v33_v8 }
  0x92   :  { %v21_v9 = vpop.xlane.xlu0 %20 }
  0x93   :  { %v26_v10 = vmul.f32 0.03125, %v21_v9 }
  0x94   :  { %v32_v11 = vpop.xlane.xlu1 %31 }
  0x95   :  { %v38_v12 = vmul.f32 %v26_v10, %v26_v10  ;;  %v36_v13 = vmul.f32 0.03125, %v32_v11  ;;  %v42_v23 = vsub.f32 %v91_v1, %v26_v10 }
  0x96   :  { %v24_v14 = vpop.xlane.xlu0 %23 }
  0x97   :  { %v40_v15 = vsub.f32 %v36_v13, %v38_v12  ;;  %v27_v16 = vmul.f32 0.03125, %v24_v14 }
  0x98   :  { %v35_v17 = vpop.xlane.xlu1 %34 }
  0x99   :  { %v44_v18 = vadd.f32 1e-05, %v40_v15  ;;  %v39_v19 = vmul.f32 %v27_v16, %v27_v16  ;;  %v37_v20 = vmul.f32 0.03125, %v35_v17  ;;  %v43_v29 = vsub.f32 %v92_v2, %v27_v16 }
  0x9b   :  { %93 = vrsqrt.f32 %v44_v18  ;;  %v41_v21 = vsub.f32 %v37_v20, %v39_v19 }
  0x9d   :  { %v45_v22 = vadd.f32 1e-05, %v41_v21 }
  0x9f   :  { %95 = vrsqrt.f32 %v45_v22 }
  0xa5   :  { %v94_v24 = vpop.eup %93 }
  0xa6   :  { %v48_v26 = vmul.f32 %v94_v24, %v42_v23 }
  0xa8   :  { %v57_v28 = vmul.f32 %v83_v25, %v48_v26 }
  0xa9   :  { %v96_v30 = vpop.eup %95 }
  0xaa   :  { %v66_v31 = vadd.f32 %v84_v27, %v57_v28  ;;  %v49_v32 = vmul.f32 %v96_v30, %v43_v29 }
  0xac   :  { %v87_v33 = vpack.c.bf16 %v66_v31, %v66_v31  ;;  %v58_v34 = vmul.f32 %v83_v25, %v49_v32 }
  0xae   :  { %77 = vst.msk [vmem:[%s135_s3] sm:$0xf] %vm76_vm1, %v87_v33  ;;  %v67_v35 = vadd.f32 %v84_v27, %v58_v34 }
  0xb0   :  { %v88_v36 = vpack.c.bf16 %v67_v35, %v67_v35 }
  0xb2   :  { %78 = vst.msk [vmem:[%s135_s3 + $0x4] sm:$0xf] %vm76_vm1, %v88_v36 }

// kernel: gpt_forward.17
= control target key start
LH: loop header
LB: loop body
LE: loop exit
PB: predicated region body
PF: predicated region fallthrough
CT: control target
= control target key end

     0   :  { %vm19_vm0 = vcmask 785408   ;;  %v151_v0 = vmov 0.0   ;;  %vm152_vm1 = vmmov 0   ;;  %vm47_vm2 = vcmask 261120   ;;  %s195_s1 = inlined_call_operand.vmem [shape: bf16[32,96], index: 1, kind: input, shape index: {}]   ;;  %s196_s0 = inlined_call_operand.vmem [shape: bf16[16,32], index: 0, kind: input, shape index: {}]   ;;  %s197_s2 = inlined_call_operand.vmem [shape: f32[1,96], index: 2, kind: input, shape index: {}]   ;;  %s198_s3 = inlined_call_operand.vmem [shape: bf16[16,96], index: 3, kind: output, shape index: {}]  }
   0x1   :  { %138 = vmatprep.subr.bf16.mxu0 %v151_v0  ;;  %v148_v1 = vld [vmem:[%s195_s1] sm:$0xff]   ;;  %142 = vmatprep.mubr.msk.bf16.mxu0 %vm152_vm1, %v151_v0  ;;  %20 = vst.msk [vmem:[#allocation2] sm:$0xff] %vm19_vm0, %v151_v0  ;;  %21 = vst.msk [vmem:[#allocation2 + $0x8] sm:$0xff] %vm19_vm0, %v151_v0  ;;  %v149_v2 = vld [vmem:[%s195_s1 + $0x8] sm:$0xff]   ;;  %vm119_vm3 = vcmask 781312  }
   0x2   :  { %139 = vmatpush3.bf16.msra.mxu0 %v148_v1  ;;  %v150_v3 = vld [vmem:[%s196_s0] sm:$0xff]  }
   0x3   :  { %140 = vmatprep.subr.bf16.mxu0 %v151_v0  ;;  %v130_v12 = vld [vmem:[%s197_s2] ss:$0 sm:$0xff] }
   0x6   :  { %141 = vmatpush3.bf16.msra.mxu0 %v149_v2 }
   0x8   :  { %v28_v4 = vld [vmem:[#allocation2] sm:$0xff]  ;;  %v29_v6 = vld [vmem:[#allocation2 + $0x8] sm:$0xff] }
   0x9   :  { %143 = vmatmul.mubr.msk.bf16.vlgmr.msra.gmra.mrb[0].mxu0 %vm47_vm2, %v150_v3 }
  0xdc   :  { %v85_v5 = vpop.f32.mrb[0].mxu0 }
  0xdd   :  { %v92_v7 = vadd.f32 %v85_v5, %v28_v4  ;;  %v144_v8 = vpop.f32.mrb[1].mxu0 }
  0xde   :  { %v88_v9 = vpop.f32.mrb[2].mxu0 }
  0xdf   :  { %95 = vst.msk [vmem:[#allocation2] sm:$0xff] %vm19_vm0, %v92_v7  ;;  %v93_v10 = vadd.f32 %v88_v9, %v29_v6  ;;  %v145_v11 = vpop.f32.mrb[3].mxu0 }
  0xe1   :  { %96 = vst.msk [vmem:[#allocation2 + $0x8] sm:$0xff] %vm19_vm0, %v93_v10 }
  0xe6   :  { %v100_v13 = vld [vmem:[#allocation2] sm:$0xff] }
  0xe7   :  { %v109_v14 = vadd.f32 %v130_v12, %v100_v13 }
  0xe8   :  { %v101_v15 = vld [vmem:[#allocation2 + $0x8] sm:$0xff] }
  0xe9   :  { %v133_v16 = vpack.c.bf16 %v109_v14, %v109_v14  ;;  %v110_v17 = vadd.f32 %v130_v12, %v101_v15 }
  0xeb   :  { %120 = vst.msk [vmem:[%s198_s3] sm:$0xf] %vm119_vm3, %v133_v16  ;;  %v134_v18 = vpack.c.bf16 %v110_v17, %v110_v17 }
  0xed   :  { %121 = vst.msk [vmem:[%s198_s3 + $0x4] sm:$0xf] %vm119_vm3, %v134_v18 }

// kernel: gpt_forward.21
= control target key start
LH: loop header
LB: loop body
LE: loop exit
PB: predicated region body
PF: predicated region fallthrough
CT: control target
= control target key end

     0   :  { %v175_v0 = vmov 0.0   ;;  %vm176_vm0 = vmmov 0   ;;  %vm46_vm1 = vcmask 261120   ;;  %s212_s1 = inlined_call_operand.vmem [shape: bf16[32,128], index: 1, kind: input, shape index: {}]   ;;  %s213_s0 = inlined_call_operand.vmem [shape: bf16[16,32], index: 0, kind: input, shape index: {}]   ;;  %s214_s2 = inlined_call_operand.vmem [shape: f32[1,128], index: 2, kind: input, shape index: {}]   ;;  %s215_s3 = inlined_call_operand.vmem [shape: bf16[16,128], index: 3, kind: output, shape index: {}]  }
   0x1   :  { %158 = vmatprep.subr.bf16.mxu0 %v175_v0  ;;  %v168_v1 = vld [vmem:[%s212_s1] sm:$0xff]   ;;  %162 = vmatprep.mubr.msk.bf16.mxu0 %vm176_vm0, %v175_v0  ;;  %v169_v2 = vld [vmem:[%s212_s1 + $0x8] sm:$0xff]  }
   0x2   :  { %159 = vmatpush3.bf16.msra.mxu0 %v168_v1  ;;  %v170_v3 = vld [vmem:[%s213_s0] sm:$0xff]  }
   0x3   :  { %160 = vmatprep.subr.bf16.mxu0 %v175_v0  ;;  %v145_v4 = vld [vmem:[%s214_s2] ss:$0 sm:$0xff] }
   0x6   :  { %161 = vmatpush3.bf16.msra.mxu0 %v169_v2 }
   0x9   :  { %163 = vmatmul.mubr.msk.bf16.vlgmr.msra.gmra.mrb[0].mxu0 %vm46_vm1, %v170_v3 }
  0xdc   :  { %v84_v5 = vpop.f32.mrb[0].mxu0 }
  0xdd   :  { %v107_v6 = vadd.f32 %v145_v4, %v84_v5  ;;  %v164_v7 = vpop.f32.mrb[1].mxu0 }
  0xde   :  { %v87_v8 = vpop.f32.mrb[2].mxu0 }
  0xdf   :  { %v111_v9 = vmul.f32 0.044715, %v107_v6  ;;  %v108_v10 = vadd.f32 %v145_v4, %v87_v8  ;;  %v165_v11 = vpop.f32.mrb[3].mxu0  ;;  %v109_v24 = vmul.f32 0.5, %v107_v6 }
  0xe1   :  { %v113_v12 = vmul.f32 %v111_v9, %v107_v6  ;;  %v112_v13 = vmul.f32 0.044715, %v108_v10  ;;  %v110_v25 = vmul.f32 0.5, %v108_v10 }
  0xe3   :  { %v115_v14 = vmul.f32 %v113_v12, %v107_v6  ;;  %v114_v15 = vmul.f32 %v112_v13, %v108_v10 }
  0xe5   :  { %v117_v16 = vadd.f32 %v115_v14, %v107_v6  ;;  %v116_v17 = vmul.f32 %v114_v15, %v108_v10 }
  0xe7   :  { %v119_v18 = vmul.f32 0.7978846, %v117_v16  ;;  %v118_v19 = vadd.f32 %v116_v17, %v108_v10 }
  0xe9   :  { %171 = vtanh.f32 %v119_v18  ;;  %v120_v20 = vmul.f32 0.7978846, %v118_v19 }
  0xeb   :  { %173 = vtanh.f32 %v120_v20 }
  0xf3   :  { %v172_v21 = vpop.eup %171 }
  0xf4   :  { %v123_v22 = vadd.f32 1.0, %v172_v21 }
  0xf5   :  { %v174_v23 = vpop.eup %173 }
  0xf6   :  { %v124_v26 = vadd.f32 1.0, %v174_v23  ;;  %v125_v27 = vmul.f32 %v123_v22, %v109_v24 }
  0xf8   :  { %v126_v28 = vmul.f32 %v124_v26, %v110_v25 }
  0xfa   :  { %v153_v29 = vpack.c.bf16 %v126_v28, %v125_v27 }
  0xfc   :  { %154 = vst [vmem:[%s215_s3] sm:$0xff] %v153_v29  }

// kernel: gpt_forward.31
= control target key start
LH: loop header
LB: loop body
LE: loop exit
PB: predicated region body
PF: predicated region fallthrough
CT: control target
= control target key end

     0   :  { %vm144_vm0 = vcmask 261120   ;;  %s461_s0 = inlined_call_operand.vmem [shape: bf16[16,32], index: 0, kind: input, shape index: {}]   ;;  %s462_s1 = inlined_call_operand.vmem [shape: bf16[256,32], index: 1, kind: input, shape index: {}]   ;;  %s463_s2 = inlined_call_operand.hbm [shape: f32[16,256], index: 2, kind: output, shape index: {}]  }
   0x1   :  { %v321_v0 = vld [vmem:[%s462_s1 + $0x40] sm:$0xff]   ;;  %v323_v2 = vld [vmem:[%s462_s1 + $0x48] sm:$0xff]   ;;  %v325_v6 = vld [vmem:[%s462_s1 + $0x50] sm:$0xff]  }
   0x2   :  { %v322_v1 = vld [vmem:[%s462_s1] sm:$0xff]   ;;  %310 = vmatprep.subr.msk.bf16.mxu0 %vm144_vm0, %v321_v0  ;;  %v324_v4 = vld [vmem:[%s462_s1 + $0x8] sm:$0xff]   ;;  %v326_v7 = vld [vmem:[%s462_s1 + $0x10] sm:$0xff]  }
   0x3   :  { %v149_v3 = vsel %vm144_vm0, %v322_v1, 0  ;;  %v152_v5 = vsel %vm144_vm0, %v324_v4, 0  ;;  %v337_v8 = vld [vmem:[%s461_s0] sm:$0xff]   ;;  %v155_v9 = vsel %vm144_vm0, %v326_v7, 0  ;;  %v327_v10 = vld [vmem:[%s462_s1 + $0x58] sm:$0xff]  }
   0x4   :  { %293 = vmatpush3.bf16.xpose.msra.mxu0 %v149_v3 }
   0x5   :  { %311 = vmatprep.subr.msk.bf16.mxu0 %vm144_vm0, %v323_v2 }
   0xc   :  { %295 = vmatpush3.bf16.xpose.msra.mxu0 %v152_v5 }
   0xd   :  { %312 = vmatprep.subr.msk.bf16.mxu0 %vm144_vm0, %v325_v6 }
   0xe   :  { %7 = vsyncpa [#allocation4], 0  ;;  %308 = vmatprep.mubr.msk.bf16.mxu0 %vm144_vm0, %v337_v8  ;;  %v328_v11 = vld [vmem:[%s462_s1 + $0x18] sm:$0xff]   ;;  %v329_v13 = vld [vmem:[%s462_s1 + $0x60] sm:$0xff]   ;;  %s362_s14 = smov [#allocation3]  }
   0xf   :  { %v158_v12 = vsel %vm144_vm0, %v328_v11, 0  ;;  %v330_v14 = vld [vmem:[%s462_s1 + $0x20] sm:$0xff]   ;;  %v331_v16 = vld [vmem:[%s462_s1 + $0x68] sm:$0xff]   ;;  %v333_v19 = vld [vmem:[%s462_s1 + $0x70] sm:$0xff]   ;;  %s263_s15 = sshll.u32 %s362_s14, 4  ;;  %s264_s15 = int_to_ptr.vmem [resolvable:$true] %s263_s15 }
  0x10   :  { %v161_v15 = vsel %vm144_vm0, %v330_v14, 0  ;;  %v332_v17 = vld [vmem:[%s462_s1 + $0x28] sm:$0xff]   ;;  %v334_v20 = vld [vmem:[%s462_s1 + $0x30] sm:$0xff]   ;;  %v335_v22 = vld [vmem:[%s462_s1 + $0x78] sm:$0xff]   ;;  %s338_s16 = scalar_lea.vmem %s264_s15, 512  ;;  %p343_p1 = scmp.lt.s32.totalorder %s264_s15, %s264_s15 }
  0x11   :  { %v164_v18 = vsel %vm144_vm0, %v332_v17, 0  ;;  %v167_v21 = vsel %vm144_vm0, %v334_v20, 0  ;;  %v336_v23 = vld [vmem:[%s462_s1 + $0x38] sm:$0xff]   ;;  %p339_p0 = scmp.ne.s32.totalorder %s264_s15, %s338_s16  ;;  %p344_p2 = scmp.lt.s32.totalorder %s338_s16, %s338_s16 }
  0x12   :  { %v170_v24 = vsel %vm144_vm0, %v336_v23, 0 }
  0x13   :  { %p345_p3 = por %p344_p2, %p343_p1 }
  0x14   :  { %297 = vmatpush3.bf16.xpose.msra.mxu0 %v155_v9 }
  0x15   :  { %313 = vmatprep.subr.msk.bf16.mxu0 %vm144_vm0, %v327_v10  ;;  %p346_p4 = pnand %p345_p3, %p339_p0 }
  0x1c   :  { %299 = vmatpush3.bf16.xpose.msra.mxu0 %v158_v12 }
  0x1d   :  { %314 = vmatprep.subr.msk.bf16.mxu0 %vm144_vm0, %v329_v13 }
  0x24   :  { %301 = vmatpush3.bf16.xpose.msra.mxu0 %v161_v15 }
  0x25   :  { %315 = vmatprep.subr.msk.bf16.mxu0 %vm144_vm0, %v331_v16 }
  0x2c   :  { %303 = vmatpush3.bf16.xpose.msra.mxu0 %v164_v18 }
  0x2d   :  { %316 = vmatprep.subr.msk.bf16.mxu0 %vm144_vm0, %v333_v19 }
  0x34   :  { %305 = vmatpush3.bf16.xpose.msra.mxu0 %v167_v21 }
  0x35   :  { %317 = vmatprep.subr.msk.bf16.mxu0 %vm144_vm0, %v335_v22 }
  0x3c   :  { %307 = vmatpush3.bf16.xpose.msra.mxu0 %v170_v24 }
  0x43   :  { %309 = vmatmul.mubr.msk.bf16.vlgmr.msra.gmra.mrb[0].mxu0 %vm144_vm0, %v337_v8 }
 0x116   :  { %v230_v25 = vpop.f32.mrb[0].mxu0 }
 0x117   :  { %254 = vst [vmem:[#allocation3] sm:$0xff] %v230_v25  ;;  %v232_v26 = vpop.f32.mrb[1].mxu0 }
 0x118   :  { %255 = vst [vmem:[#allocation3 + $0x8] sm:$0xff] %v232_v26  ;;  %v234_v27 = vpop.f32.mrb[2].mxu0 }
 0x119   :  { %256 = vst [vmem:[#allocation3 + $0x10] sm:$0xff] %v234_v27  ;;  %v236_v28 = vpop.f32.mrb[3].mxu0 }
 0x11a   :  { %257 = vst [vmem:[#allocation3 + $0x18] sm:$0xff] %v236_v28 }
 0x11b   :  { %349 = shalt.err (!%p346_p4)
}
 0x11c   :  { %s350_s18 = scalar_lea.hbm %s463_s2, 512 }
 0x11d   :  { %p351_p5 = scmp.ne.s32.totalorder %s463_s2, %s350_s18  ;;  %p354_p6 = scmp.lt.u32.totalorder %s350_s18, %s463_s2 }
 0x11f   :  { %p356_p7 = pnand %p354_p6, %p351_p5 }
 0x121   :  { %359 = shalt.err (!%p356_p7)
}
 0x122   :  { %s363_s23 = smov 256   ;;  %s364_s24 = smov 16  }
 0x123   :  { %269 = dma.vmem_to_hbm [thread:$0]  %s264_s15, 512, %s463_s2, [#allocation4], %s363_s23, %s363_s23, %s364_s24  }
 0x124   :  { %360 = dma.done.wait [#allocation4], 512  }
 0x125   :  { %361 = vsyncadd [#allocation4], 4294966784 }
 0x126   :  { %273 = vsyncpa [#allocation4], 1 }

// kernel: gpt_forward.22
= control target key start
LH: loop header
LB: loop body
LE: loop exit
PB: predicated region body
PF: predicated region fallthrough
CT: control target
= control target key end

     0   :  { %vm22_vm0 = vcmask 261120   ;;  %v238_v0 = vmov 0.0   ;;  %vm239_vm1 = vmmov 0   ;;  %vm173_vm2 = vcmask 257024   ;;  %s308_s1 = inlined_call_operand.vmem [shape: bf16[128,32], index: 1, kind: input, shape index: {}]   ;;  %s309_s0 = inlined_call_operand.vmem [shape: bf16[16,128], index: 0, kind: input, shape index: {}]   ;;  %s310_s3 = inlined_call_operand.vmem [shape: bf16[16,32], index: 3, kind: input, shape index: {}]   ;;  %s311_s2 = inlined_call_operand.vmem [shape: f32[1,32], index: 2, kind: input, shape index: {}]   ;;  %s312_s4 = inlined_call_operand.vmem [shape: bf16[16,32], index: 4, kind: output, shape index: {}]  }
   0x1   :  { %207 = vmatprep.subr.bf16.mxu0 %v238_v0  ;;  %v229_v1 = vld [vmem:[%s308_s1] sm:$0xff]   ;;  %223 = vmatprep.mubr.msk.bf16.mxu0 %vm239_vm1, %v238_v0  ;;  %23 = vst.msk [vmem:[#allocation2] sm:$0xff] %vm22_vm0, %v238_v0  ;;  %24 = vst.msk [vmem:[#allocation2 + $0x8] sm:$0xff] %vm22_vm0, %v238_v0  ;;  %v230_v2 = vld [vmem:[%s308_s1 + $0x8] sm:$0xff]  }
   0x2   :  { %208 = vmatpush3.bf16.msra.mxu0 %v229_v1  ;;  %v231_v3 = vld [vmem:[%s308_s1 + $0x10] sm:$0xff]   ;;  %v232_v4 = vld [vmem:[%s308_s1 + $0x18] sm:$0xff]   ;;  %v233_v5 = vld [vmem:[%s308_s1 + $0x20] sm:$0xff]  }
   0x3   :  { %209 = vmatprep.subr.bf16.mxu0 %v238_v0  ;;  %v234_v6 = vld [vmem:[%s308_s1 + $0x28] sm:$0xff]   ;;  %v235_v7 = vld [vmem:[%s308_s1 + $0x30] sm:$0xff]   ;;  %v236_v8 = vld [vmem:[%s308_s1 + $0x38] sm:$0xff]  }
   0x4   :  { %v237_v9 = vld [vmem:[%s309_s0] sm:$0xff]  }
   0x5   :  { %v195_v18 = vld [vmem:[%s310_s3] sm:$0xff]  }
   0x6   :  { %210 = vmatpush3.bf16.msra.mxu0 %v230_v2  ;;  %v189_v19 = vld [vmem:[%s311_s2] ss:$0 sm:$0xff]  ;;  %v196_v20 = vunpack.c.l.bf16 %v195_v18  ;;  %v197_v23 = vunpack.c.h.bf16 %v195_v18 }
   0x7   :  { %211 = vmatprep.subr.bf16.mxu0 %v238_v0 }
   0x8   :  { %v43_v10 = vld [vmem:[#allocation2] sm:$0xff]  ;;  %v44_v12 = vld [vmem:[#allocation2 + $0x8] sm:$0xff] }
   0xa   :  { %212 = vmatpush3.bf16.msra.mxu0 %v231_v3 }
   0xb   :  { %213 = vmatprep.subr.bf16.mxu0 %v238_v0 }
   0xe   :  { %214 = vmatpush3.bf16.msra.mxu0 %v232_v4 }
   0xf   :  { %215 = vmatprep.subr.bf16.mxu0 %v238_v0 }
  0x12   :  { %216 = vmatpush3.bf16.msra.mxu0 %v233_v5 }
  0x13   :  { %217 = vmatprep.subr.bf16.mxu0 %v238_v0 }
  0x16   :  { %218 = vmatpush3.bf16.msra.mxu0 %v234_v6 }
  0x17   :  { %219 = vmatprep.subr.bf16.mxu0 %v238_v0 }
  0x1a   :  { %220 = vmatpush3.bf16.msra.mxu0 %v235_v7 }
  0x1b   :  { %221 = vmatprep.subr.bf16.mxu0 %v238_v0 }
  0x1e   :  { %222 = vmatpush3.bf16.msra.mxu0 %v236_v8 }
  0x21   :  { %224 = vmatmul.mubr.bf16.vlgmr.msra.gmra.mrb[0].mxu0 %v237_v9 }
  0xf4   :  { %v133_v11 = vpop.f32.mrb[0].mxu0 }
  0xf5   :  { %v140_v13 = vadd.f32 %v133_v11, %v43_v10  ;;  %v225_v14 = vpop.f32.mrb[1].mxu0 }
  0xf6   :  { %v136_v15 = vpop.f32.mrb[2].mxu0 }
  0xf7   :  { %143 = vst.msk [vmem:[#allocation2] sm:$0xff] %vm22_vm0, %v140_v13  ;;  %v141_v16 = vadd.f32 %v136_v15, %v44_v12  ;;  %v226_v17 = vpop.f32.mrb[3].mxu0 }
  0xf9   :  { %144 = vst.msk [vmem:[#allocation2 + $0x8] sm:$0xff] %vm22_vm0, %v141_v16 }
  0xfe   :  { %v148_v21 = vld [vmem:[#allocation2] sm:$0xff] }
  0xff   :  { %v157_v22 = vadd.f32 %v189_v19, %v148_v21 }
 0x100   :  { %v149_v24 = vld [vmem:[#allocation2 + $0x8] sm:$0xff] }
 0x101   :  { %v163_v25 = vadd.f32 %v196_v20, %v157_v22  ;;  %v158_v26 = vadd.f32 %v189_v19, %v149_v24 }
 0x103   :  { %v192_v27 = vpack.c.bf16 %v163_v25, %v163_v25  ;;  %v164_v28 = vadd.f32 %v197_v23, %v158_v26 }
 0x105   :  { %174 = vst.msk [vmem:[%s312_s4] sm:$0xf] %vm173_vm2, %v192_v27  ;;  %v193_v29 = vpack.c.bf16 %v164_v28, %v164_v28 }
 0x107   :  { %175 = vst.msk [vmem:[%s312_s4 + $0x4] sm:$0xf] %vm173_vm2, %v193_v29 }

// kernel: gpt_forward.18
= control target key start
LH: loop header
LB: loop body
LE: loop exit
PB: predicated region body
PF: predicated region fallthrough
CT: control target
= control target key end

     0   :  { %s1885_s12 = smov 0   ;;  %s1887_s13 = smov 0   ;;  %s2089_s0 = inlined_call_operand.vmem [shape: bf16[2,8,32], index: 0, kind: input, shape index: {}]   ;;  %s2090_s1 = inlined_call_operand.vmem [shape: bf16[2,8,32], index: 1, kind: input, shape index: {}]   ;;  %s2091_s2 = inlined_call_operand.vmem [shape: bf16[2,8,32], index: 2, kind: input, shape index: {}]   ;;  %s2092_s3 = inlined_call_operand.vmem [shape: bf16[2,8,32], index: 3, kind: output, shape index: {}]  }
   0x1   :  { %s1889_s14 = smov 0  }
   0x2 LB: > { %s32_s15 = sadd.s32 1, %s1849_s13  ;;  %p1657_p0 = scmp.ge.s32.totalorder %s1853_s14, 1  ;;  %s1853_s14 = sphi %s1889_s14, %s13_s14   ;;  %s1849_s13 = sphi %s1887_s13, %s2094_s13   ;;  %s1845_s12 = sphi %s1885_s12, %s2093_s12  }
   0x3   : > { %p34_p1 = scmp.ge.s32.totalorder %s32_s15, 2  ;;  %p206_p2 = scmp.lt.s32.totalorder %s1853_s14, 3 }
   0x5   : > { %s2096_s15 = smov (%p34_p1, %s32_s15), 0  ;;  %p207_p3 = pnand %p1657_p0, %p206_p2 }
   0x6   : > { %p252_p4 = scmp.lt.s32.totalorder (!%p207_p3), %s1845_s12, 1  ;;  %vm302_vm0 = vcmask (!%p207_p3), 64512   ;;  %v1855_v0 = vmov (!%p207_p3), 0.0   ;;  %vm1856_vm1 = vmmov (!%p207_p3), 0   ;;  %vm293_vm2 = vcmask (!%p207_p3), 7168   ;;  %s1859_s23 = smov (!%p207_p3), 120  }
   0x7   : > { %210 = sbr.rel (%p207_p3) target bundleno = 1469 (0x5bd), region = 32  ;;  %1714 = vmatprep.subr.bf16.mxu0 (!%p207_p3), %v1855_v0  ;;  %303 = vst.msk [vmem:[#allocation4] sm:$0xff] (!%p207_p3), %vm302_vm0, %v1855_v0  ;;  %304 = vst.msk [vmem:[#allocation4 + $0x8] sm:$0xff] (!%p207_p3), %vm302_vm0, %v1855_v0  ;;  %1716 = vmatprep.mubr.msk.bf16.mxu0 (!%p207_p3), %vm1856_vm1, %v1855_v0  ;;  %v1857_v4 = vmov (!%p207_p3), -1e+30   ;;  %v889_v5 = vlaneseq (!%p207_p3)  ;;  %v1858_v14 = vmov (!%p207_p3), 0  }
   0x8   : > { %305 = vst.msk [vmem:[#allocation4 + $0x10] sm:$0xff] (!%p207_p3), %vm302_vm0, %v1855_v0  ;;  %306 = vst.msk [vmem:[#allocation4 + $0x18] sm:$0xff] (!%p207_p3), %vm302_vm0, %v1855_v0  ;;  %1720 = vmatprep.subr.bf16.mxu1 (!%p207_p3), %v1855_v0  ;;  %1722 = vmatprep.mubr.msk.bf16.mxu1 (!%p207_p3), %vm1856_vm1, %v1855_v0  ;;  %s1860_s24 = smov (!%p207_p3), 112   ;;  %s1861_s25 = smov (!%p207_p3), 104   ;;  %vm985_vm4 = vcmask (!%p207_p3), 1043456   ;;  %vm1539_vm5 = vcmask (!%p207_p3), 130048  }
   0x9   : > { %294 = vst.msk [vmem:[#allocation2] sm:$0xff] (!%p207_p3), %vm293_vm2, %v1857_v4  ;;  %295 = vst.msk [vmem:[#allocation2 + $0x8] sm:$0xff] (!%p207_p3), %vm293_vm2, %v1857_v4  ;;  %v1950_v6 = vshrl.u32 (!%p207_p3), %v889_v5, 7  ;;  %v1952_v7 = vand.u32 (!%p207_p3), 127, %v889_v5  ;;  %1796 = vset.pattern.permute.xlu0 (!%p207_p3), %v1858_v14  ;;  %1797 = vset.pattern.permute.xlu1 (!%p207_p3), %v1858_v14  ;;  %s1862_s29 = smov (!%p207_p3), 8   ;;  %s1863_s30 = smov (!%p207_p3), 16  }
   0xa   : > { %296 = vst.msk [vmem:[#allocation2 + $0x10] sm:$0xff] (!%p207_p3), %vm293_vm2, %v1857_v4  ;;  %297 = vst.msk [vmem:[#allocation2 + $0x18] sm:$0xff] (!%p207_p3), %vm293_vm2, %v1857_v4  ;;  %s1864_s4 = smov (!%p207_p3), 24   ;;  %vm1541_vm6 = vcmask (!%p207_p3), 195584   ;;  %vm1544_vm7 = vcmask (!%p207_p3), 257024  }
   0xb   : > { %298 = vst.msk [vmem:[#allocation3] sm:$0xff] (!%p207_p3), %vm293_vm2, %v1855_v0  ;;  %299 = vst.msk [vmem:[#allocation3 + $0x8] sm:$0xff] (!%p207_p3), %vm293_vm2, %v1855_v0  ;;  %vm898_vm3 = vcmp.le.s32.totalorder (!%p207_p3), %v1952_v7, %v1950_v6 }
   0xc   : > { %300 = vst.msk [vmem:[#allocation3 + $0x10] sm:$0xff] (!%p207_p3), %vm293_vm2, %v1855_v0  ;;  %301 = vst.msk [vmem:[#allocation3 + $0x18] sm:$0xff] (!%p207_p3), %vm293_vm2, %v1855_v0 }
   0xe   : > { %s2098_s12 = smov (!%p252_p4, %s1845_s12), 1 }
   0xf   : > { %s1917_s16 = sshll.u32 %s2098_s12, 2 }
  0x10   : > { %s1923_s19 = scalar_lea.vmem %s2090_s1, %s1917_s16  ;;  %s1930_s22 = scalar_lea.vmem %s2089_s0, %s1917_s16  ;;  %v1972_v21 = vld [vmem:[#allocation2] sm:$0xff]  ;;  %v2024_v63 = vld [vmem:[#allocation2 + $0x8] sm:$0xff] }
  0x11   : > { %v900_v1 = vld [vmem:[%s1923_s19] sm:$0xf]  ;;  %s1986_s28 = scalar_lea.vmem %s2091_s2, %s1917_s16  ;;  %v2034_v4 = vld [vmem:[#allocation2 + $0x10] sm:$0xff]  ;;  %s287_s7 = scalar_lea.vmem %s2092_s3, %s1917_s16 }
  0x12   : > { %v907_v2 = vsel %vm302_vm0, %v900_v1, 0  ;;  %v899_v3 = vld [vmem:[%s1930_s22] sm:$0xf] }
  0x13   : > { %1715 = vmatpush3.bf16.xpose.msra.mxu0 %v907_v2  ;;  %v1798_v15 = vld [vmem:[%s1923_s19] ss:$0 sps:$4 sm:$0xff]  }
  0x14   : > { %1732 = vmatprep.subr.bf16.mxu0 %v1855_v0  ;;  %1043 = vrot.lane.b32.xlu1 %v1798_v15, %s1859_s23  ;;  %v1799_v16 = vld [vmem:[%s1930_s22] ss:$0 sps:$4 sm:$0xff]  }
  0x15   : > { %v1800_v17 = vld [vmem:[%s1923_s19] ss:$0 sps:$4 sm:$0xff]  }
  0x16   : > { %v1801_v18 = vld [vmem:[%s1930_s22] ss:$0 sps:$4 sm:$0xff]  }
  0x17   : > { %v1802_v19 = vld [vmem:[%s1923_s19] ss:$0 sps:$4 sm:$0xff]  }
  0x18   : > { %1038 = vrot.lane.b32.xlu1 %v1799_v16, %s1859_s23  ;;  %v1803_v20 = vld [vmem:[%s1930_s22] ss:$0 sps:$4 sm:$0xff]  }
  0x19   : > { %v901_v25 = vld [vmem:[%s1986_s28] sm:$0xf] }
  0x1a   : > { %1717 = vmatmul.mubr.msk.bf16.vlgmr.msra.gmra.mrb[0].mxu0 %vm302_vm0, %v899_v3  ;;  %v987_v26 = vsel %vm985_vm4, %v901_v25, 0  ;;  %v1806_v14 = vld [vmem:[%s1986_s28] ss:$0 sps:$4 sm:$0xff]  }
  0x1b   : > { %1734 = vmatprep.mubr.msk.bf16.mxu0 %vm1856_vm1, %v1855_v0  ;;  %1721 = vmatpush3.bf16.msra.mxu1 %v987_v26 }
  0x1c   : > { %1191 = vrot.lane.b32.xlu1 %v1800_v17, %s1860_s24  ;;  %1726 = vmatprep.subr.bf16.mxu1 %v1855_v0 }
  0x20   : > { %1186 = vrot.lane.b32.xlu1 %v1801_v18, %s1860_s24 }
  0x24   : > { %1339 = vrot.lane.b32.xlu1 %v1802_v19, %s1861_s25 }
  0x28   : > { %1334 = vrot.lane.b32.xlu1 %v1803_v20, %s1861_s25 }
  0x86   : > { %v1044_v30 = vpop.permute.xlu1 %1043 }
  0x87   : > { %v1049_v33 = vsel %vm302_vm0, %v1044_v30, 0 }
  0x8a   : > { %v1039_v31 = vpop.permute.xlu1 %1038 }
  0x8e   : > { %v1192_v35 = vpop.permute.xlu1 %1191 }
  0x8f   : > { %v1197_v37 = vsel %vm302_vm0, %v1192_v35, 0 }
  0x92   : > { %v1187_v36 = vpop.permute.xlu1 %1186 }
  0x96   : > { %v1340_v38 = vpop.permute.xlu1 %1339 }
  0x97   : > { %v1345_v39 = vsel %vm302_vm0, %v1340_v38, 0 }
  0x9a   : > { %v1335_v40 = vpop.permute.xlu1 %1334 }
  0xed   : > { %v943_v8 = vpop.f32.mrb[0].mxu0 }
  0xee   : > { %v949_v9 = vsel %vm898_vm3, %v943_v8, -1e+30  ;;  %v1718_v10 = vpop.f32.mrb[1].mxu0  ;;  %v1389_v8 = vld [vmem:[#allocation2 + $0x18] sm:$0xff] }
  0xef   : > { %v946_v11 = vpop.f32.mrb[2].mxu0  ;;  %v951_v12 = vsel %vm302_vm0, %v949_v9, -inf }
  0xf0   : > { %952 = vmax.xlane.f32.xlu0 %v951_v12  ;;  %v1719_v13 = vpop.f32.mrb[3].mxu0  ;;  %v1804_v12 = vld [vmem:[%s1986_s28] ss:$0 sps:$4 sm:$0xff]  }
  0xf1   : > { %v1805_v13 = vld [vmem:[%s1986_s28] ss:$0 sps:$4 sm:$0xff]  }
 0x17d   : > { %v953_v22 = vpop.xlane.xlu0 %952 }
 0x17e   : > { %v1975_v23 = vmax.f32 %v1972_v21, %v953_v22 }
 0x180   : > { %v955_v24 = vsub.f32 %v1972_v21, %v1975_v23  ;;  %1031 = vst.msk [vmem:[#allocation2] sm:$0xff] %vm293_vm2, %v1975_v23  ;;  %960 = vperm.xlu0 %1796, %v1975_v23  }
 0x1ff   : > { %v961_v27 = vpop.permute.xlu0 %960 }
 0x200   : > { %v963_v28 = vsub.f32 %v949_v9, %v961_v27 }
 0x202   : > { %v964_v29 = vmul.f32 1.442695, %v963_v28 }
 0x204   : > { %1807 = vpow2.f32 %v964_v29 }
 0x20e   : > { %v1991_v32 = vpop.eup %1807 }
 0x20f   : > { %v981_v34 = vpack.c.bf16 %v1991_v32, %v1991_v32  ;;  %v968_v15 = vsel %vm302_vm0, %v1991_v32, 0.0 }
 0x211   : > { %1723 = vmatmul.mubr.msk.bf16.vlgmr.msra.gmra.mrb[0].mxu1 %vm302_vm0, %v981_v34 }
 0x212   : > { %1727 = vmatpush3.bf16.xpose.msra.mxu1 %v1049_v33  ;;  %1728 = vmatprep.mubr.msk.bf16.mxu1 %vm1856_vm1, %v1855_v0 }
 0x213   : > { %1738 = vmatprep.subr.bf16.mxu1 %v1855_v0 }
 0x219   : > { %1729 = vmatmul.mubr.msk.bf16.vlgmr.msra.gmra.mrb[4].mxu1 %vm302_vm0, %v1039_v31 }
 0x21a   : > { %1739 = vmatpush3.bf16.xpose.msra.mxu1 %v1197_v37  ;;  %1740 = vmatprep.mubr.msk.bf16.mxu1 %vm1856_vm1, %v1855_v0 }
 0x21b   : > { %1750 = vmatprep.subr.bf16.mxu1 %v1855_v0 }
 0x221   : > { %1741 = vmatmul.mubr.msk.bf16.vlgmr.msra.gmra.mrb[8].mxu1 %vm302_vm0, %v1187_v36 }
 0x222   : > { %1751 = vmatpush3.bf16.xpose.msra.mxu1 %v1345_v39  ;;  %1752 = vmatprep.mubr.msk.bf16.mxu1 %vm1856_vm1, %v1855_v0 }
 0x229   : > { %1753 = vmatmul.mubr.msk.bf16.vlgmr.msra.gmra.mrb[12].mxu1 %vm302_vm0, %v1335_v40 }
 0x2e4   : > { %v2010_v41 = vpop.f32.mrb[0].mxu1 }
 0x2e5   : > { %v1724_v42 = vpop.f32.mrb[1].mxu1 }
 0x2e6   : > { %v1026_v43 = vpop.f32.mrb[2].mxu1  ;;  %v956_v42 = vmul.f32 1.442695, %v955_v24 }
 0x2e7   : > { %v1725_v44 = vpop.f32.mrb[3].mxu1 }
 0x2ec   : > { %v1085_v45 = vpop.f32.mrb[4].mxu1 }
 0x2ed   : > { %v1091_v46 = vsel %vm898_vm3, %v1085_v45, -1e+30  ;;  %v1730_v47 = vpop.f32.mrb[5].mxu1 }
 0x2ee   : > { %v1088_v48 = vpop.f32.mrb[6].mxu1  ;;  %v1094_v49 = vsel %vm302_vm0, %v1091_v46, -inf }
 0x2ef   : > { %1095 = vmax.xlane.f32.xlu1 %v1094_v49  ;;  %v1731_v50 = vpop.f32.mrb[7].mxu1  ;;  %v966_v49 = vld [vmem:[#allocation3] sm:$0xff] }
 0x2f4   : > { %v1233_v51 = vpop.f32.mrb[8].mxu1 }
 0x2f5   : > { %v1239_v52 = vsel %vm898_vm3, %v1233_v51, -1e+30  ;;  %v1742_v53 = vpop.f32.mrb[9].mxu1 }
 0x2f6   : > { %v1236_v54 = vpop.f32.mrb[10].mxu1  ;;  %v1242_v55 = vsel %vm302_vm0, %v1239_v52, -inf }
 0x2f7   : > { %1243 = vmax.xlane.f32.xlu0 %v1242_v55  ;;  %v1743_v56 = vpop.f32.mrb[11].mxu1  ;;  %v1110_v55 = vld [vmem:[#allocation3 + $0x8] sm:$0xff] }
 0x2fc   : > { %v1381_v57 = vpop.f32.mrb[12].mxu1 }
 0x2fd   : > { %v1387_v58 = vsel %vm898_vm3, %v1381_v57, -1e+30  ;;  %v1754_v59 = vpop.f32.mrb[13].mxu1 }
 0x2fe   : > { %v1384_v60 = vpop.f32.mrb[14].mxu1  ;;  %v1390_v61 = vsel %vm302_vm0, %v1387_v58, -inf  ;;  %v1258_v59 = vld [vmem:[#allocation3 + $0x10] sm:$0xff] }
 0x2ff   : > { %1391 = vmax.xlane.f32.xlu1 %v1390_v61  ;;  %v1755_v62 = vpop.f32.mrb[15].mxu1 }
 0x37c   : > { %v1096_v1 = vpop.xlane.xlu1 %1095 }
 0x37d   : > { %v2027_v2 = vmax.f32 %v2024_v63, %v1096_v1 }
 0x37f   : > { %v1098_v3 = vsub.f32 %v2024_v63, %v2027_v2  ;;  %1179 = vst.msk [vmem:[#allocation2 + $0x8] sm:$0xff] %vm293_vm2, %v2027_v2  ;;  %1103 = vperm.xlu1 %1797, %v2027_v2   ;;  %v1406_v2 = vld [vmem:[#allocation3 + $0x18] sm:$0xff] }
 0x381   : > { %v1099_v44 = vmul.f32 1.442695, %v1098_v3  ;;  %v974_v3 = vld [vmem:[#allocation4] sm:$0xff] }
 0x384   : > { %v1244_v5 = vpop.xlane.xlu0 %1243 }
 0x385   : > { %v1245_v6 = vmax.f32 %v2034_v4, %v1244_v5 }
 0x387   : > { %v1246_v7 = vsub.f32 %v2034_v4, %v1245_v6  ;;  %1327 = vst.msk [vmem:[#allocation2 + $0x10] sm:$0xff] %vm293_vm2, %v1245_v6  ;;  %1251 = vperm.xlu0 %1796, %v1245_v6  }
 0x38c   : > { %v1392_v9 = vpop.xlane.xlu1 %1391 }
 0x38d   : > { %v1393_v10 = vmax.f32 %v1389_v8, %v1392_v9 }
 0x38f   : > { %v1394_v11 = vsub.f32 %v1389_v8, %v1393_v10  ;;  %1475 = vst.msk [vmem:[#allocation2 + $0x18] sm:$0xff] %vm293_vm2, %v1393_v10  ;;  %1399 = vperm.xlu1 %1797, %v1393_v10  }
 0x391   : > { %v1395_v45 = vmul.f32 1.442695, %v1394_v11 }
 0x393   : > { %1129 = vrot.lane.b32.xlu1 %v1804_v12, %s1859_s23 }
 0x397   : > { %1277 = vrot.lane.b32.xlu1 %v1805_v13, %s1860_s24 }
 0x39b   : > { %1425 = vrot.lane.b32.xlu1 %v1806_v14, %s1861_s25 }
 0x3bf   : > { %969 = vadd.xlane.f32.xlu1 %v968_v15 }
 0x3fe   : > { %v1104_v16 = vpop.permute.xlu1 %1103 }
 0x3ff   : > { %v1106_v17 = vsub.f32 %v1091_v46, %v1104_v16  ;;  %v1247_v46 = vmul.f32 1.442695, %v1246_v7 }
 0x401   : > { %v1107_v18 = vmul.f32 1.442695, %v1106_v17  ;;  %v1118_v17 = vld [vmem:[#allocation4 + $0x8] sm:$0xff] }
 0x403   : > { %1809 = vpow2.f32 %v1107_v18 }
 0x406   : > { %v1252_v19 = vpop.permute.xlu0 %1251 }
 0x407   : > { %v1254_v20 = vsub.f32 %v1239_v52, %v1252_v19 }
 0x409   : > { %v1255_v22 = vmul.f32 1.442695, %v1254_v20 }
 0x40b   : > { %1811 = vpow2.f32 %v1255_v22 }
 0x40d   : > { %v1810_v25 = vpop.eup %1809 }
 0x40e   : > { %v1400_v26 = vpop.permute.xlu1 %1399  ;;  %v1112_v27 = vsel %vm302_vm0, %v1810_v25, 0.0  ;;  %v1125_v33 = vpack.c.bf16 %v1810_v25, %v1810_v25 }
 0x40f   : > { %v1402_v28 = vsub.f32 %v1387_v58, %v1400_v26  ;;  %1113 = vadd.xlane.f32.xlu0 %v1112_v27  ;;  %v1266_v27 = vld [vmem:[#allocation4 + $0x10] sm:$0xff] }
 0x411   : > { %v1403_v29 = vmul.f32 1.442695, %v1402_v28 }
 0x412   : > { %v1130_v30 = vpop.permute.xlu1 %1129 }
 0x413   : > { %1813 = vpow2.f32 %v1403_v29  ;;  %v1135_v31 = vsel %vm985_vm4, %v1130_v30, 0 }
 0x414   : > { %1733 = vmatpush3.bf16.msra.mxu0 %v1135_v31  ;;  %1815 = vpow2.f32 %v956_v42 }
 0x415   : > { %v1812_v32 = vpop.eup %1811  ;;  %1744 = vmatprep.subr.bf16.mxu0 %v1855_v0  ;;  %1817 = vpow2.f32 %v1099_v44 }
 0x416   : > { %v1260_v34 = vsel %vm302_vm0, %v1812_v32, 0.0  ;;  %v1278_v35 = vpop.permute.xlu1 %1277  ;;  %v1273_v39 = vpack.c.bf16 %v1812_v32, %v1812_v32  ;;  %1819 = vpow2.f32 %v1395_v45 }
 0x417   : > { %1261 = vadd.xlane.f32.xlu0 %v1260_v34  ;;  %1735 = vmatmul.mubr.msk.bf16.vlgmr.msra.gmra.mrb[4].mxu0 %vm302_vm0, %v1125_v33  ;;  %v1283_v36 = vsel %vm985_vm4, %v1278_v35, 0  ;;  %1821 = vpow2.f32 %v1247_v46  ;;  %v1414_v35 = vld [vmem:[#allocation4 + $0x18] sm:$0xff] }
 0x418   : > { %1745 = vmatpush3.bf16.msra.mxu0 %v1283_v36  ;;  %1746 = vmatprep.mubr.msk.bf16.mxu0 %vm1856_vm1, %v1855_v0 }
 0x419   : > { %1756 = vmatprep.subr.bf16.mxu0 %v1855_v0 }
 0x41a   : > { %v1426_v37 = vpop.permute.xlu1 %1425 }
 0x41b   : > { %v1431_v40 = vsel %vm985_vm4, %v1426_v37, 0 }
 0x41d   : > { %v1814_v38 = vpop.eup %1813 }
 0x41e   : > { %v1408_v43 = vsel %vm302_vm0, %v1814_v38, 0.0  ;;  %v1421_v47 = vpack.c.bf16 %v1814_v38, %v1814_v38  ;;  %v1816_v21 = vpop.eup %1815 }
 0x41f   : > { %1747 = vmatmul.mubr.msk.bf16.vlgmr.msra.gmra.mrb[8].mxu0 %vm302_vm0, %v1273_v39  ;;  %1409 = vadd.xlane.f32.xlu1 %v1408_v43  ;;  %v1818_v23 = vpop.eup %1817 }
 0x420   : > { %1757 = vmatpush3.bf16.msra.mxu0 %v1431_v40  ;;  %1758 = vmatprep.mubr.msk.bf16.mxu0 %vm1856_vm1, %v1855_v0  ;;  %v1820_v24 = vpop.eup %1819  ;;  %v967_v0 = vmul.f32 %v1816_v21, %v966_v49  ;;  %v1111_v56 = vmul.f32 %v1818_v23, %v1110_v55 }
 0x421   : > { %v1822_v48 = vpop.eup %1821  ;;  %v1407_v4 = vmul.f32 %v1820_v24, %v1406_v2 }
 0x422   : > { %v1259_v60 = vmul.f32 %v1822_v48, %v1258_v59 }
 0x427   : > { %1759 = vmatmul.mubr.msk.bf16.vlgmr.msra.gmra.mrb[12].mxu0 %vm302_vm0, %v1421_v47 }
 0x42d   : > { %977 = vperm.xlu0 %1796, %v1816_v21  }
 0x430   : > { %1121 = vperm.xlu1 %1797, %v1818_v23  }
 0x431   : > { %1417 = vperm.xlu0 %1796, %v1820_v24  }
 0x434   : > { %1269 = vperm.xlu1 %1797, %v1822_v48  }
 0x44c   : > { %v970_v50 = vpop.xlane.xlu1 %969 }
 0x44d   : > { %v971_v51 = vadd.f32 %v970_v50, %v967_v0 }
 0x44f   : > { %973 = vst.msk [vmem:[#allocation3] sm:$0xff] %vm293_vm2, %v971_v51 }
 0x456   : > { %v1479_v52 = vld [vmem:[#allocation3] sm:$0xff] }
 0x457   : > { %v1480_v53 = vmax.f32 %v1479_v52, 1e-20 }
 0x459   : > { %1823 = vrcp.f32 %v1480_v53 }
 0x463   : > { %v1824_v54 = vpop.eup %1823 }
 0x464   : > { %1485 = vperm.xlu1 %1797, %v1824_v54  }
 0x49c   : > { %v1114_v57 = vpop.xlane.xlu0 %1113 }
 0x49d   : > { %v1115_v58 = vadd.f32 %v1114_v57, %v1111_v56 }
 0x49f   : > { %1116 = vst.msk [vmem:[#allocation3 + $0x8] sm:$0xff] %vm293_vm2, %v1115_v58 }
 0x4a4   : > { %v1262_v61 = vpop.xlane.xlu0 %1261 }
 0x4a5   : > { %v1263_v62 = vadd.f32 %v1262_v61, %v1259_v60 }
 0x4a6   : > { %v1490_v63 = vld [vmem:[#allocation3 + $0x8] sm:$0xff] }
 0x4a7   : > { %1264 = vst.msk [vmem:[#allocation3 + $0x10] sm:$0xff] %vm293_vm2, %v1263_v62  ;;  %v1491_v1 = vmax.f32 %v1490_v63, 1e-20 }
 0x4a9   : > { %1825 = vrcp.f32 %v1491_v1 }
 0x4ac   : > { %v1410_v5 = vpop.xlane.xlu1 %1409  ;;  %v978_v6 = vpop.permute.xlu0 %977 }
 0x4ad   : > { %v1411_v7 = vadd.f32 %v1410_v5, %v1407_v4  ;;  %v980_v8 = vmul.f32 %v978_v6, %v974_v3 }
 0x4ae   : > { %v1502_v9 = vld [vmem:[#allocation3 + $0x10] sm:$0xff] }
 0x4af   : > { %1412 = vst.msk [vmem:[#allocation3 + $0x18] sm:$0xff] %vm293_vm2, %v1411_v7  ;;  %v1029_v10 = vadd.f32 %v2010_v41, %v980_v8  ;;  %v1503_v11 = vmax.f32 %v1502_v9, 1e-20 }
 0x4b0   : > { %v1122_v18 = vpop.permute.xlu1 %1121  ;;  %v1418_v36 = vpop.permute.xlu0 %1417 }
 0x4b1   : > { %1030 = vst.msk [vmem:[#allocation4] sm:$0xff] %vm302_vm0, %v1029_v10  ;;  %1827 = vrcp.f32 %v1503_v11  ;;  %v1124_v19 = vmul.f32 %v1122_v18, %v1118_v17  ;;  %v1420_v37 = vmul.f32 %v1418_v36, %v1414_v35 }
 0x4b3   : > { %v1826_v12 = vpop.eup %1825 }
 0x4b4   : > { %1497 = vperm.xlu0 %1796, %v1826_v12   ;;  %v1270_v28 = vpop.permute.xlu1 %1269 }
 0x4b5   : > { %v1272_v29 = vmul.f32 %v1270_v28, %v1266_v27 }
 0x4b6   : > { %v1514_v13 = vld [vmem:[#allocation3 + $0x18] sm:$0xff] }
 0x4b7   : > { %v1515_v14 = vmax.f32 %v1514_v13, 1e-20 }
 0x4b8   : > { %v1482_v50 = vld [vmem:[#allocation4] sm:$0xff] }
 0x4b9   : > { %1829 = vrcp.f32 %v1515_v14 }
 0x4bb   : > { %v1828_v15 = vpop.eup %1827 }
 0x4bc   : > { %1509 = vperm.xlu1 %1797, %v1828_v15  }
 0x4c3   : > { %v1830_v16 = vpop.eup %1829 }
 0x4c4   : > { %1521 = vperm.xlu0 %1796, %v1830_v16  }
 0x4e3   : > { %v1486_v47 = vpop.permute.xlu1 %1485 }
 0x4e4   : > { %v1488_v52 = vmul.f32 %v1486_v47, %v1482_v50 }
 0x4ea   : > { %v1171_v20 = vpop.f32.mrb[4].mxu0 }
 0x4eb   : > { %v1177_v22 = vadd.f32 %v1171_v20, %v1124_v19  ;;  %v1736_v25 = vpop.f32.mrb[5].mxu0 }
 0x4ec   : > { %v1174_v41 = vpop.f32.mrb[6].mxu0 }
 0x4ed   : > { %1178 = vst.msk [vmem:[#allocation4 + $0x8] sm:$0xff] %vm302_vm0, %v1177_v22  ;;  %v1737_v26 = vpop.f32.mrb[7].mxu0 }
 0x4f2   : > { %v1319_v30 = vpop.f32.mrb[8].mxu0 }
 0x4f3   : > { %v1325_v31 = vadd.f32 %v1319_v30, %v1272_v29  ;;  %v1748_v32 = vpop.f32.mrb[9].mxu0 }
 0x4f4   : > { %v1322_v33 = vpop.f32.mrb[10].mxu0  ;;  %v1494_v45 = vld [vmem:[#allocation4 + $0x8] sm:$0xff] }
 0x4f5   : > { %1326 = vst.msk [vmem:[#allocation4 + $0x10] sm:$0xff] %vm302_vm0, %v1325_v31  ;;  %v1749_v34 = vpop.f32.mrb[11].mxu0 }
 0x4fa   : > { %v1467_v38 = vpop.f32.mrb[12].mxu0 }
 0x4fb   : > { %v1473_v39 = vadd.f32 %v1467_v38, %v1420_v37  ;;  %v1760_v40 = vpop.f32.mrb[13].mxu0 }
 0x4fc   : > { %v1470_v42 = vpop.f32.mrb[14].mxu0  ;;  %v1506_v23 = vld [vmem:[#allocation4 + $0x10] sm:$0xff] }
 0x4fd   : > { %1474 = vst.msk [vmem:[#allocation4 + $0x18] sm:$0xff] %vm302_vm0, %v1473_v39  ;;  %v1761_v43 = vpop.f32.mrb[15].mxu0 }
 0x504   : > { %v1518_v49 = vld [vmem:[#allocation4 + $0x18] sm:$0xff] }
 0x533   : > { %v1498_v44 = vpop.permute.xlu0 %1497 }
 0x534   : > { %v1500_v46 = vmul.f32 %v1498_v44, %v1494_v45 }
 0x536   : > { %1526 = vrot.lane.b32.xlu1 %v1500_v46, %s1862_s29 }
 0x53b   : > { %v1510_v21 = vpop.permute.xlu1 %1509 }
 0x53c   : > { %v1512_v24 = vmul.f32 %v1510_v21, %v1506_v23 }
 0x53e   : > { %1530 = vrot.lane.b32.xlu0 %v1512_v24, %s1863_s30 }
 0x543   : > { %v1522_v48 = vpop.permute.xlu0 %1521 }
 0x544   : > { %v1524_v0 = vmul.f32 %v1522_v48, %v1518_v49 }
 0x546   : > { %1534 = vrot.lane.b32.xlu1 %v1524_v0, %s1864_s4 }
 0x5a8   : > { %v1527_v51 = vpop.permute.xlu1 %1526 }
 0x5a9   : > { %v1538_v54 = vsel %vm302_vm0, %v1488_v52, %v1527_v51 }
 0x5b0   : > { %v1531_v53 = vpop.permute.xlu0 %1530 }
 0x5b1   : > { %v1540_v55 = vsel %vm1539_vm5, %v1538_v54, %v1531_v53 }
 0x5b8   : > { %v1535_v56 = vpop.permute.xlu1 %1534 }
 0x5b9   : > { %v1542_v57 = vsel %vm1541_vm6, %v1540_v55, %v1535_v56 }
 0x5ba   : > { %v1543_v58 = vpack.c.bf16 %v1542_v57, %v1542_v57 }
 0x5bc   : > { %1545 = vst.msk [vmem:[%s287_s7] sm:$0xf] %vm1544_vm7, %v1543_v58 }
 0x5bd PF: > { %s13_s14 = sadd.s32 1, %s1853_s14   ;;  %s2093_s12 = smov %s1849_s13 }
 0x5be   : > { %p10_p5 = scmp.ge.s32.totalorder %s13_s14, 4   ;;  %s2094_s13 = smov %s2096_s15 }
 0x5c0   :  { %12 = sbr.rel (!%p10_p5) target bundleno = 2 (0x2), region = 108 }

</bundles_post_ra>
